<compile_context>
chip_gen: v5e
topology: v5e:2x2
jax: 0.10.0
libtpu: 0.0.40
codegen_flags: <defaults>
</compile_context>

<pallas_src>
import jax
import jax.numpy as jnp
from jax import lax
from jax.experimental import pallas as pl
from jax.experimental.pallas import tpu as pltpu

NC_PAD = 128  # label one-hot / w1_lab padded to a full lane width


def _round_up(x, m):
    return ((x + m - 1) // m) * m


def cgan_disc_kernel(x_ref, lab_ref, w1_ref, w1l_ref, b1_ref, w2_ref, b2_ref,
                     w3_ref, b3_ref, out_ref):
    """MLP: concat([img, one_hot(label)]) @ W1 + b1 -> LeakyReLU(0.2)
            -> Linear(512,256) -> LeakyReLU(0.2) -> Linear(256,1) -> Sigmoid.

    x_ref:   (TB, 1024) f32      lab_ref: (TB, 1) int32
    w1_ref:  (1024, 512) bf16    w1l_ref: (128, 512) bf16 (rows >= n_classes are 0)
    b1_ref:  (1, 512) f32        w2_ref:  (512, 256) bf16
    b2_ref:  (1, 256) f32        w3_ref:  (1, 256) f32    b3_ref: (1, 1) f32
    out_ref: (TB, 1) f32
    """
    tb = x_ref.shape[0]

    # Layer 1 image part: cast to bf16 in-kernel (hidden under MXU), K=1024.
    x_bf16 = x_ref[...].astype(jnp.bfloat16)
    h1 = jnp.dot(x_bf16, w1_ref[...], preferred_element_type=jnp.float32)

    # Layer 1 label part: in-kernel one-hot + tiny resident matmul.
    lab = lab_ref[...]                                           # (TB, 1) int32
    cls = lax.broadcasted_iota(jnp.int32, (tb, NC_PAD), 1)       # (TB, 128)
    one_hot = (cls == lab).astype(jnp.bfloat16)                  # (TB, 128)
    h1 = h1 + jnp.dot(one_hot, w1l_ref[...],
                      preferred_element_type=jnp.float32)

    h1 = h1 + b1_ref[...]
    h1 = jnp.where(h1 > 0, h1, 0.2 * h1)                         # LeakyReLU(0.2)

    # Layer 2: bf16 matmul, f32 accumulate.
    h2 = jnp.dot(h1.astype(jnp.bfloat16), w2_ref[...],
                 preferred_element_type=jnp.float32)
    h2 = h2 + b2_ref[...]
    h2 = jnp.where(h2 > 0, h2, 0.2 * h2)                         # LeakyReLU(0.2)

    # Layer 3 (256 -> 1): broadcast-multiply + lane reduction (no 1-lane matmul).
    h3 = jnp.sum(h2 * w3_ref[...], axis=-1, keepdims=True) + b3_ref[...]

    out_ref[...] = jax.nn.sigmoid(h3)                            # EUP, f32


def init_params(key, img_dim, n_classes, dtype=jnp.float32):
    """PyTorch-style Linear init U(-1/sqrt(fan_in), +1/sqrt(fan_in)).

    Linear(input_dim, 512)'s weight is stored split as w1_img (img_dim, 512)
    and w1_lab (n_classes, 512); mathematically identical to multiplying the
    concatenated [img_flat, one_hot] input by the full weight.
    """
    input_dim = img_dim + n_classes
    key, k_wi, k_wl, k_b1, k_w2, k_b2, k_w3, k_b3 = jax.random.split(key, 8)

    b1_bound = 1.0 / jnp.sqrt(jnp.asarray(input_dim, dtype))
    w1_img = jax.random.uniform(k_wi, (img_dim, 512), dtype, -b1_bound, b1_bound)
    w1_lab = jax.random.uniform(k_wl, (n_classes, 512), dtype, -b1_bound, b1_bound)
    b1 = jax.random.uniform(k_b1, (1, 512), dtype, -b1_bound, b1_bound)

    b2_bound = 1.0 / jnp.sqrt(jnp.asarray(512, dtype))
    w2 = jax.random.uniform(k_w2, (512, 256), dtype, -b2_bound, b2_bound)
    b2 = jax.random.uniform(k_b2, (1, 256), dtype, -b2_bound, b2_bound)

    b3_bound = 1.0 / jnp.sqrt(jnp.asarray(256, dtype))
    w3 = jax.random.uniform(k_w3, (1, 256), dtype, -b3_bound, b3_bound)
    b3 = jax.random.uniform(k_b3, (1, 1), dtype, -b3_bound, b3_bound)

    return (w1_img, w1_lab, b1, w2, b2, w3, b3)


def cgan_discriminator_forward(img, labels, params, n_classes):
    """img: (B, C, H, W) float32 (NCHW); labels: (B,) int32.
    Returns validity: (B, 1) float32."""
    w1_img, w1_lab, b1, w2, b2, w3, b3 = params

    B = img.shape[0]
    img_flat = img.reshape(B, -1)                     # stays f32, cast in-kernel
    D = img_flat.shape[1]
    H1 = w1_img.shape[1]

    # Small VMEM-resident weights: bf16 matmul operands, w1_lab zero-padded to
    # a full 128-lane class axis (padded rows contribute 0).
    w1_bf16 = w1_img.astype(jnp.bfloat16)
    w2_bf16 = w2.astype(jnp.bfloat16)
    w1_lab_p = jnp.zeros((NC_PAD, H1), jnp.bfloat16).at[:n_classes].set(
        w1_lab.astype(jnp.bfloat16))

    labels2d = labels.reshape(B, 1).astype(jnp.int32)

    # Only tiny batches (< 8 rows) need padding; otherwise rely on Pallas's
    # masked partial last tile (no full-batch jnp.pad copy).
    Bp = B
    if B < 8:
        Bp = 8
        pad = Bp - B
        img_flat = jnp.pad(img_flat, ((0, pad), (0, 0)))
        labels2d = jnp.pad(labels2d, ((0, pad), (0, 0)))

    # >= 2 grid steps when possible so v7x's two TensorCores split the batch;
    # TB capped at 512 rows (safe within default/raised scoped VMEM everywhere).
    TB = min(512, _round_up(max(pl.cdiv(Bp, 2), 1), 8))
    grid = (pl.cdiv(Bp, TB),)

    const2d = lambda i: (0, 0)
    in_specs = [
        pl.BlockSpec((TB, D), lambda i: (i, 0)),       # img_flat tile (f32)
        pl.BlockSpec((TB, 1), lambda i: (i, 0)),       # labels tile (int32)
        pl.BlockSpec((D, H1), const2d),                # w1_img (bf16, resident)
        pl.BlockSpec((NC_PAD, H1), const2d),           # w1_lab padded (bf16)
        pl.BlockSpec((1, H1), const2d),                # b1
        pl.BlockSpec((H1, 256), const2d),              # w2 (bf16, resident)
        pl.BlockSpec((1, 256), const2d),               # b2
        pl.BlockSpec((1, 256), const2d),               # w3 row
        pl.BlockSpec((1, 1), const2d),                 # b3
    ]
    out_specs = pl.BlockSpec((TB, 1), lambda i: (i, 0))

    weight_bytes = (w1_bf16.size * 2 + w1_lab_p.size * 2 + w2_bf16.size * 2
                    + b1.size * 4 + b2.size * 4 + w3.size * 4 + b3.size * 4)
    act_bytes = Bp * (D * 4 + 4 + 4)                   # img f32 + label + out
    cost = pl.CostEstimate(
        flops=2 * Bp * (D * H1 + NC_PAD * H1 + H1 * 256 + 256),
        transcendentals=2 * Bp,                        # sigmoid: exp + reciprocal
        bytes_accessed=weight_bytes + act_bytes,
    )

    out = pl.pallas_call(
        cgan_disc_kernel,
        out_shape=jax.ShapeDtypeStruct((Bp, 1), jnp.float32),
        grid=grid,
        in_specs=in_specs,
        out_specs=out_specs,
        compiler_params=pltpu.CompilerParams(
            dimension_semantics=("parallel",),         # 2-TC batch split on v7x
            vmem_limit_bytes=32 * 1024 * 1024),
        cost_estimate=cost,
    )(img_flat, labels2d, w1_bf16, w1_lab_p, b1, w2_bf16, b2, w3, b3)

    return out[:B]


def _reference_forward(img, labels, params, n_classes):
    """Pure-JAX f32 reference matching the PyTorch module."""
    w1_img, w1_lab, b1, w2, b2, w3, b3 = params
    B = img.shape[0]
    x = img.reshape(B, -1)
    one_hot = jax.nn.one_hot(labels, n_classes, dtype=jnp.float32)
    h1 = x @ w1_img + one_hot @ w1_lab + b1
    h1 = jnp.where(h1 > 0, h1, 0.2 * h1)
    h2 = h1 @ w2 + b2
    h2 = jnp.where(h2 > 0, h2, 0.2 * h2)
    h3 = h2 @ w3.T + b3
    return jax.nn.sigmoid(h3)


if __name__ == "__main__":
    # Small shapes consistent with the module: img_shape=(4, 16, 16), 9 classes.
    B = 2
    C, H, W = 4, 16, 16
    n_classes = 9
    img_dim = C * H * W                                # 1024 (MXU-aligned K)

    key = jax.random.PRNGKey(0)
    k_img, k_lab, k_par = jax.random.split(key, 3)

    img = jax.random.normal(k_img, (B, C, H, W), jnp.float32)
    labels = jax.random.randint(k_lab, (B,), 0, n_classes, jnp.int32)
    params = init_params(k_par, img_dim, n_classes)

    validity = cgan_discriminator_forward(img, labels, params, n_classes)
    validity = jax.block_until_ready(validity)

    assert validity.shape == (B, 1)
    assert bool(jnp.all((validity >= 0.0) & (validity <= 1.0)))

    # Loose tolerance: MXU operands are bf16 (f32 accumulate).
    ref = _reference_forward(img, labels, params, n_classes)
    assert bool(jnp.allclose(validity, ref, atol=5e-2)), (validity, ref)

    print("KERNEL_OK")
</pallas_src>

<mosaic_0001>
module attributes {stable_mosaic.version = 11 : i64} {
  func.func @cgan_disc_kernel(%arg0: i32, %arg1: memref<8x1024xf32, #tpu.memory_space<vmem>>, %arg2: memref<8x1xi32, #tpu.memory_space<vmem>>, %arg3: memref<1024x512xbf16, #tpu.memory_space<vmem>>, %arg4: memref<128x512xbf16, #tpu.memory_space<vmem>>, %arg5: memref<1x512xf32, #tpu.memory_space<vmem>>, %arg6: memref<512x256xbf16, #tpu.memory_space<vmem>>, %arg7: memref<1x256xf32, #tpu.memory_space<vmem>>, %arg8: memref<1x256xf32, #tpu.memory_space<vmem>>, %arg9: memref<1x1xf32, #tpu.memory_space<vmem>>, %arg10: memref<8x1xf32, #tpu.memory_space<vmem>>) attributes {dimension_semantics = [#tpu.dimension_semantics<parallel>], iteration_bounds = array<i64: 1>, scalar_prefetch = 0 : i64, scratch_operands = 0 : i64, tpu.core_type = #tpu.core_type<tc>, window_params = [{transform_indices = @transform_0, window_bounds = array<i64: 8, 1024>}, {transform_indices = @transform_1, window_bounds = array<i64: 8, 1>}, {pipeline_mode = #tpu.pipeline_mode<synchronous>, transform_indices = @transform_2, window_bounds = array<i64: 1024, 512>}, {pipeline_mode = #tpu.pipeline_mode<synchronous>, transform_indices = @transform_3, window_bounds = array<i64: 128, 512>}, {pipeline_mode = #tpu.pipeline_mode<synchronous>, transform_indices = @transform_4, window_bounds = array<i64: 1, 512>}, {pipeline_mode = #tpu.pipeline_mode<synchronous>, transform_indices = @transform_5, window_bounds = array<i64: 512, 256>}, {pipeline_mode = #tpu.pipeline_mode<synchronous>, transform_indices = @transform_6, window_bounds = array<i64: 1, 256>}, {pipeline_mode = #tpu.pipeline_mode<synchronous>, transform_indices = @transform_7, window_bounds = array<i64: 1, 256>}, {pipeline_mode = #tpu.pipeline_mode<synchronous>, transform_indices = @transform_8, window_bounds = array<i64: 1, 1>}, {transform_indices = @transform_9, window_bounds = array<i64: 8, 1>}]} {
    %c0 = arith.constant 0 : index
    %c0_0 = arith.constant 0 : index
    %0 = vector.load %arg1[%c0, %c0_0] : memref<8x1024xf32, #tpu.memory_space<vmem>>, vector<8x1024xf32>
    %1 = arith.truncf %0 : vector<8x1024xf32> to vector<8x1024xbf16>
    %c0_1 = arith.constant 0 : index
    %c0_2 = arith.constant 0 : index
    %2 = vector.load %arg3[%c0_1, %c0_2] : memref<1024x512xbf16, #tpu.memory_space<vmem>>, vector<1024x512xbf16>
    %cst = arith.constant dense<0.000000e+00> : vector<8x512xf32>
    %3 = tpu.matmul %1, %2, %cst {dimension_numbers = #tpu.dot_dimension_numbers<[1], [0], [0], [1], [0, 0, 1, 1], [], []>} : vector<8x1024xbf16>, vector<1024x512xbf16>, vector<8x512xf32> -> vector<8x512xf32>
    %c0_3 = arith.constant 0 : index
    %c0_4 = arith.constant 0 : index
    %4 = vector.load %arg2[%c0_3, %c0_4] : memref<8x1xi32, #tpu.memory_space<vmem>>, vector<8x1xi32>
    %5 = tpu.iota {dimensions = array<i32: 1>} : vector<8x128xi32>
    %6 = vector.broadcast %4 : vector<8x1xi32> to vector<8x128xi32>
    %7 = arith.cmpi eq, %5, %6 : vector<8x128xi32>
    %8 = arith.extui %7 : vector<8x128xi1> to vector<8x128xi32>
    %9 = arith.sitofp %8 : vector<8x128xi32> to vector<8x128xf32>
    %10 = arith.truncf %9 : vector<8x128xf32> to vector<8x128xbf16>
    %c0_5 = arith.constant 0 : index
    %c0_6 = arith.constant 0 : index
    %11 = vector.load %arg4[%c0_5, %c0_6] : memref<128x512xbf16, #tpu.memory_space<vmem>>, vector<128x512xbf16>
    %cst_7 = arith.constant dense<0.000000e+00> : vector<8x512xf32>
    %12 = tpu.matmul %10, %11, %cst_7 {dimension_numbers = #tpu.dot_dimension_numbers<[1], [0], [0], [1], [0, 0, 1, 1], [], []>} : vector<8x128xbf16>, vector<128x512xbf16>, vector<8x512xf32> -> vector<8x512xf32>
    %13 = arith.addf %3, %12 : vector<8x512xf32>
    %c0_8 = arith.constant 0 : index
    %c0_9 = arith.constant 0 : index
    %14 = vector.load %arg5[%c0_8, %c0_9] : memref<1x512xf32, #tpu.memory_space<vmem>>, vector<1x512xf32>
    %15 = vector.broadcast %14 : vector<1x512xf32> to vector<8x512xf32>
    %16 = arith.addf %13, %15 : vector<8x512xf32>
    %cst_10 = arith.constant 0.000000e+00 : f32
    %17 = vector.broadcast %cst_10 : f32 to vector<8x512xf32>
    %18 = arith.cmpf ogt, %16, %17 : vector<8x512xf32>
    %cst_11 = arith.constant 2.000000e-01 : f32
    %19 = vector.broadcast %cst_11 : f32 to vector<8x512xf32>
    %20 = arith.mulf %19, %16 : vector<8x512xf32>
    %21 = arith.select %18, %16, %20 : vector<8x512xi1>, vector<8x512xf32>
    %22 = arith.truncf %21 : vector<8x512xf32> to vector<8x512xbf16>
    %c0_12 = arith.constant 0 : index
    %c0_13 = arith.constant 0 : index
    %23 = vector.load %arg6[%c0_12, %c0_13] : memref<512x256xbf16, #tpu.memory_space<vmem>>, vector<512x256xbf16>
    %cst_14 = arith.constant dense<0.000000e+00> : vector<8x256xf32>
    %24 = tpu.matmul %22, %23, %cst_14 {dimension_numbers = #tpu.dot_dimension_numbers<[1], [0], [0], [1], [0, 0, 1, 1], [], []>} : vector<8x512xbf16>, vector<512x256xbf16>, vector<8x256xf32> -> vector<8x256xf32>
    %c0_15 = arith.constant 0 : index
    %c0_16 = arith.constant 0 : index
    %25 = vector.load %arg7[%c0_15, %c0_16] : memref<1x256xf32, #tpu.memory_space<vmem>>, vector<1x256xf32>
    %26 = vector.broadcast %25 : vector<1x256xf32> to vector<8x256xf32>
    %27 = arith.addf %24, %26 : vector<8x256xf32>
    %cst_17 = arith.constant 0.000000e+00 : f32
    %28 = vector.broadcast %cst_17 : f32 to vector<8x256xf32>
    %29 = arith.cmpf ogt, %27, %28 : vector<8x256xf32>
    %cst_18 = arith.constant 2.000000e-01 : f32
    %30 = vector.broadcast %cst_18 : f32 to vector<8x256xf32>
    %31 = arith.mulf %30, %27 : vector<8x256xf32>
    %32 = arith.select %29, %27, %31 : vector<8x256xi1>, vector<8x256xf32>
    %c0_19 = arith.constant 0 : index
    %c0_20 = arith.constant 0 : index
    %33 = vector.load %arg8[%c0_19, %c0_20] : memref<1x256xf32, #tpu.memory_space<vmem>>, vector<1x256xf32>
    %34 = vector.broadcast %33 : vector<1x256xf32> to vector<8x256xf32>
    %35 = arith.mulf %32, %34 : vector<8x256xf32>
    %cst_21 = arith.constant dense<0.000000e+00> : vector<8xf32>
    %36 = vector.multi_reduction <add>, %35, %cst_21 [1] : vector<8x256xf32> to vector<8xf32>
    %37 = vector.shape_cast %36 : vector<8xf32> to vector<8x1xf32>
    %c0_22 = arith.constant 0 : index
    %c0_23 = arith.constant 0 : index
    %38 = vector.load %arg9[%c0_22, %c0_23] : memref<1x1xf32, #tpu.memory_space<vmem>>, vector<1x1xf32>
    %39 = vector.broadcast %38 : vector<1x1xf32> to vector<8x1xf32>
    %40 = arith.addf %37, %39 : vector<8x1xf32>
    %41 = arith.negf %40 : vector<8x1xf32>
    %42 = math.exp %41 : vector<8x1xf32>
    %cst_24 = arith.constant 1.000000e+00 : f32
    %43 = vector.broadcast %cst_24 : f32 to vector<8x1xf32>
    %44 = arith.addf %43, %42 : vector<8x1xf32>
    %45 = arith.divf %43, %44 : vector<8x1xf32>
    %c0_25 = arith.constant 0 : index
    %c0_26 = arith.constant 0 : index
    %46 = vector.load %arg10[%c0_25, %c0_26] : memref<8x1xf32, #tpu.memory_space<vmem>>, vector<8x1xf32>
    tpu.vector_store %arg10[%c0_25, %c0_26], %45 {strides = array<i32>} : memref<8x1xf32, #tpu.memory_space<vmem>>, vector<8x1xf32>,
    return
  }
  func.func @transform_0(%arg0: i32) -> (i32, i32) {
    %c0_i32 = arith.constant 0 : i32
    %c0_i32_0 = arith.constant 0 : i32
    return %arg0, %c0_i32 : i32, i32
  }
  func.func @transform_1(%arg0: i32) -> (i32, i32) {
    %c0_i32 = arith.constant 0 : i32
    %c0_i32_0 = arith.constant 0 : i32
    return %arg0, %c0_i32 : i32, i32
  }
  func.func @transform_2(%arg0: i32) -> (i32, i32) {
    %c0_i32 = arith.constant 0 : i32
    %c0_i32_0 = arith.constant 0 : i32
    %c0_i32_1 = arith.constant 0 : i32
    return %c0_i32, %c0_i32_0 : i32, i32
  }
  func.func @transform_3(%arg0: i32) -> (i32, i32) {
    %c0_i32 = arith.constant 0 : i32
    %c0_i32_0 = arith.constant 0 : i32
    %c0_i32_1 = arith.constant 0 : i32
    return %c0_i32, %c0_i32_0 : i32, i32
  }
  func.func @transform_4(%arg0: i32) -> (i32, i32) {
    %c0_i32 = arith.constant 0 : i32
    %c0_i32_0 = arith.constant 0 : i32
    %c0_i32_1 = arith.constant 0 : i32
    return %c0_i32, %c0_i32_0 : i32, i32
  }
  func.func @transform_5(%arg0: i32) -> (i32, i32) {
    %c0_i32 = arith.constant 0 : i32
    %c0_i32_0 = arith.constant 0 : i32
    %c0_i32_1 = arith.constant 0 : i32
    return %c0_i32, %c0_i32_0 : i32, i32
  }
  func.func @transform_6(%arg0: i32) -> (i32, i32) {
    %c0_i32 = arith.constant 0 : i32
    %c0_i32_0 = arith.constant 0 : i32
    %c0_i32_1 = arith.constant 0 : i32
    return %c0_i32, %c0_i32_0 : i32, i32
  }
  func.func @transform_7(%arg0: i32) -> (i32, i32) {
    %c0_i32 = arith.constant 0 : i32
    %c0_i32_0 = arith.constant 0 : i32
    %c0_i32_1 = arith.constant 0 : i32
    return %c0_i32, %c0_i32_0 : i32, i32
  }
  func.func @transform_8(%arg0: i32) -> (i32, i32) {
    %c0_i32 = arith.constant 0 : i32
    %c0_i32_0 = arith.constant 0 : i32
    %c0_i32_1 = arith.constant 0 : i32
    return %c0_i32, %c0_i32_0 : i32, i32
  }
  func.func @transform_9(%arg0: i32) -> (i32, i32) {
    %c0_i32 = arith.constant 0 : i32
    %c0_i32_0 = arith.constant 0 : i32
    return %arg0, %c0_i32 : i32, i32
  }
}

</mosaic_0001>

<bundles_post_ra>
// kernel: tpu_custom_call.1
= control target key start
LH: loop header
LB: loop body
LE: loop exit
PB: predicated region body
PF: predicated region fallthrough
CT: control target
= control target key end

     0   :  { %s4965_s0 = inlined_call_operand.hbm [shape: f32[8,1024], index: 0, kind: input, shape index: {}]   ;;  %s4966_s1 = inlined_call_operand.vmem [shape: s32[8,1], index: 1, kind: input, shape index: {}]   ;;  %s4967_s2 = inlined_call_operand.hbm [shape: bf16[1024,512], index: 2, kind: input, shape index: {}]   ;;  %s4968_s3 = inlined_call_operand.hbm [shape: bf16[128,512], index: 3, kind: input, shape index: {}]   ;;  %s4969_s4 = inlined_call_operand.vmem [shape: f32[1,512], index: 4, kind: input, shape index: {}]   ;;  %s4970_s5 = inlined_call_operand.hbm [shape: bf16[512,256], index: 5, kind: input, shape index: {}]   ;;  %s4971_s6 = inlined_call_operand.vmem [shape: f32[1,256], index: 6, kind: input, shape index: {}]   ;;  %s4972_s7 = inlined_call_operand.vmem [shape: f32[1,256], index: 7, kind: input, shape index: {}]   ;;  %s4973_s8 = inlined_call_operand.<no memory space> [shape: f32[1,1], index: 8, kind: input, shape index: {}]   ;;  %s4974_s9 = inlined_call_operand.vmem [shape: f32[8,1], index: 9, kind: output, shape index: {}]  }
   0x1   :  { %v14_v0 = vstv %s4973_s8 }
   0x2   :  { %15 = vst [vmem:[#allocation2] sm:$0x1] %v14_v0 }
   0x3   :  { %16 = vsyncpa [#allocation4], 0 }
   0x4   :  { %17 = vsyncpa [#allocation6], 0  ;;  %s36_s13 = sshll.u32 %s4967_s2, 4  ;;  %s37_s13 = int_to_ptr.hbm [resolvable:$true] %s36_s13 }
   0x5   :  { %18 = vsyncpa [#allocation9], 0  ;;  %s4779_s14 = smov [#allocation5]   ;;  %s24_s18 = sshll.u32 %s4965_s0, 4  ;;  %s25_s18 = int_to_ptr.hbm [resolvable:$true] %s24_s18 }
   0x6   :  { %s38_s15 = sshll.u32 %s4779_s14, 4  ;;  %s4780_s19 = smov 256   ;;  %s39_s15 = int_to_ptr.vmem [resolvable:$true] %s38_s15 }
   0x7   :  { %s4781_s20 = smov 16   ;;  %s4782_s8 = smov [#allocation3]  }
   0x8   :  { %44 = dma.hbm_to_vmem [thread:$0]  %s37_s13, 32768, %s39_s15, [#allocation6], %s4780_s19, %s4780_s19, %s4781_s20  }
   0x9   :  { %s26_s21 = sshll.u32 %s4782_s8, 4  ;;  %s49_s24 = sshll.u32 %s4968_s3, 4  ;;  %s27_s21 = int_to_ptr.vmem [resolvable:$true] %s26_s21  ;;  %s50_s24 = int_to_ptr.hbm [resolvable:$true] %s49_s24 }
   0xa   :  { %29 = dma.hbm_to_vmem [thread:$0]  %s25_s18, 1024, %s27_s21, [#allocation4]  }
   0xb   :  { %s64_s26 = sshll.u32 %s4970_s5, 4  ;;  %s4783_s27 = smov [#allocation7]   ;;  %s65_s26 = int_to_ptr.hbm [resolvable:$true] %s64_s26 }
   0xc   :  { %s51_s28 = sshll.u32 %s4783_s27, 4  ;;  %s4784_s0 = smov [#allocation8]   ;;  %s52_s28 = int_to_ptr.vmem [resolvable:$true] %s51_s28 }
   0xd   :  { %57 = dma.hbm_to_vmem [thread:$0]  %s50_s24, 4096, %s52_s28, [#allocation6], %s4780_s19, %s4780_s19, %s4781_s20  }
   0xe   :  { %s66_s29 = sshll.u32 %s4784_s0, 4  ;;  %s4785_s30 = smov 128   ;;  %s67_s29 = int_to_ptr.vmem [resolvable:$true] %s66_s29 }
   0xf   :  { %s4786_s10 = smov 8  }
  0x10   :  { %72 = dma.hbm_to_vmem [thread:$0]  %s65_s26, 8192, %s67_s29, [#allocation9], %s4785_s30, %s4785_s30, %s4786_s10  }
  0x11   :  { %4773 = dma.done.wait [#allocation4], 1024  }
  0x12   :  { %4774 = vsyncadd [#allocation4], 4294966272 }
  0x13   :  { %4775 = dma.done.wait [#allocation6], 36864  }
  0x14   :  { %4776 = vsyncadd [#allocation6], 4294930432 }
  0x15   :  { %4777 = dma.done.wait [#allocation9], 8192  }
  0x16   :  { %4778 = vsyncadd [#allocation9], 4294959104  ;;  %v4787_v1 = vmov 0   ;;  %v367_v2 = vld [vmem:[%s4966_s1] sm:$0xff]  ;;  %v4595_v4 = vld [vmem:[#allocation7 + $0xec] sm:$0xf0] }
  0x17   :  { %4671 = vset.pattern.permute.xlu0 %v4787_v1  ;;  %v3006_v3 = vld [vmem:[#allocation7 + $0xe0] sm:$0xf]  ;;  %v4593_v6 = vld [vmem:[#allocation7 + $0xe4] sm:$0xf]  ;;  %v3008_v7 = vld [vmem:[#allocation7 + $0xf0] sm:$0xf0] }
  0x18   :  { %371 = vperm.xlu0 %4671, %v367_v2   ;;  %v3007_v5 = vor.u32 %v4595_v4, %v3006_v3  ;;  %v3014_v8 = vld [vmem:[#allocation7 + $0xe8] sm:$0xf]  ;;  %v3011_v9 = vor.u32 %v4593_v6, %v3008_v7  ;;  %v4596_v10 = vld [vmem:[#allocation7 + $0xf4] sm:$0xf0]  ;;  %v4594_v11 = vld [vmem:[#allocation7 + $0xec] sm:$0xf] }
  0x19   :  { %v3016_v12 = vld [vmem:[#allocation7 + $0xf8] sm:$0xf0]  ;;  %v3015_v13 = vor.u32 %v4596_v10, %v3014_v8  ;;  %v2990_v15 = vld [vmem:[#allocation7 + $0xc0] sm:$0xf]  ;;  %v4591_v16 = vld [vmem:[#allocation7 + $0xcc] sm:$0xf0] }
  0x1a   :  { %569 = vmatpush.bf16.msra.mxu0 %v3007_v5  ;;  %v3019_v14 = vor.u32 %v4594_v11, %v3016_v12  ;;  %v4589_v17 = vld [vmem:[#allocation7 + $0xc4] sm:$0xf]  ;;  %582 = vmatpush.bf16.msra.mxu1 %v3011_v9  ;;  %v2991_v18 = vor.u32 %v4591_v16, %v2990_v15  ;;  %v2992_v19 = vld [vmem:[#allocation7 + $0xd0] sm:$0xf0]  ;;  %v2998_v20 = vld [vmem:[#allocation7 + $0xc8] sm:$0xf] }
  0x1b   :  { %v4592_v21 = vld [vmem:[#allocation7 + $0xd4] sm:$0xf0]  ;;  %595 = vmatpush.bf16.msra.mxu2 %v3015_v13  ;;  %v2995_v22 = vor.u32 %v4589_v17, %v2992_v19  ;;  %v4590_v24 = vld [vmem:[#allocation7 + $0xcc] sm:$0xf]  ;;  %v3000_v25 = vld [vmem:[#allocation7 + $0xd8] sm:$0xf0] }
  0x1c   :  { %608 = vmatpush.bf16.msra.mxu3 %v3019_v14  ;;  %v2999_v23 = vor.u32 %v4592_v21, %v2998_v20  ;;  %v2974_v26 = vld [vmem:[#allocation7 + $0xa0] sm:$0xf]  ;;  %v3003_v27 = vor.u32 %v4590_v24, %v3000_v25  ;;  %v4587_v28 = vld [vmem:[#allocation7 + $0xac] sm:$0xf0]  ;;  %v4585_v29 = vld [vmem:[#allocation7 + $0xa4] sm:$0xf] }
  0x1d   :  { %v2976_v30 = vld [vmem:[#allocation7 + $0xb0] sm:$0xf0]  ;;  %v2975_v31 = vor.u32 %v4587_v28, %v2974_v26  ;;  %v2982_v32 = vld [vmem:[#allocation7 + $0xa8] sm:$0xf]  ;;  %v4588_v33 = vld [vmem:[#allocation7 + $0xb4] sm:$0xf0] }
  0x1e   :  { %570 = vmatpush.bf16.msra.mxu0 %v2991_v18  ;;  %v4586_v34 = vld [vmem:[#allocation7 + $0xac] sm:$0xf]  ;;  %583 = vmatpush.bf16.msra.mxu1 %v2995_v22  ;;  %v2979_v35 = vor.u32 %v4585_v29, %v2976_v30  ;;  %v2984_v36 = vld [vmem:[#allocation7 + $0xb8] sm:$0xf0]  ;;  %v2958_v37 = vld [vmem:[#allocation7 + $0x80] sm:$0xf]  ;;  %v2983_v39 = vor.u32 %v4588_v33, %v2982_v32 }
  0x1f   :  { %v4583_v38 = vld [vmem:[#allocation7 + $0x8c] sm:$0xf0]  ;;  %596 = vmatpush.bf16.msra.mxu2 %v2999_v23  ;;  %v2987_v40 = vor.u32 %v4586_v34, %v2984_v36  ;;  %v4581_v41 = vld [vmem:[#allocation7 + $0x84] sm:$0xf]  ;;  %v2960_v42 = vld [vmem:[#allocation7 + $0x90] sm:$0xf0] }
  0x20   :  { %609 = vmatpush.bf16.msra.mxu3 %v3003_v27  ;;  %v2966_v43 = vld [vmem:[#allocation7 + $0x88] sm:$0xf]  ;;  %v4584_v44 = vld [vmem:[#allocation7 + $0x94] sm:$0xf0]  ;;  %v4582_v45 = vld [vmem:[#allocation7 + $0x8c] sm:$0xf]  ;;  %v2959_v47 = vor.u32 %v4583_v38, %v2958_v37  ;;  %v2963_v48 = vor.u32 %v4581_v41, %v2960_v42 }
  0x21   :  { %v2968_v46 = vld [vmem:[#allocation7 + $0x98] sm:$0xf0]  ;;  %v2942_v49 = vld [vmem:[#allocation7 + $0x60] sm:$0xf]  ;;  %v4579_v50 = vld [vmem:[#allocation7 + $0x6c] sm:$0xf0]  ;;  %v2967_v51 = vor.u32 %v4584_v44, %v2966_v43 }
  0x22   :  { %571 = vmatpush.bf16.msra.mxu0 %v2975_v31  ;;  %584 = vmatpush.bf16.msra.mxu1 %v2979_v35  ;;  %v2971_v52 = vor.u32 %v4582_v45, %v2968_v46  ;;  %v4577_v53 = vld [vmem:[#allocation7 + $0x64] sm:$0xf]  ;;  %v2944_v54 = vld [vmem:[#allocation7 + $0x70] sm:$0xf0]  ;;  %v2950_v55 = vld [vmem:[#allocation7 + $0x68] sm:$0xf]  ;;  %v2943_v59 = vor.u32 %v4579_v50, %v2942_v49 }
  0x23   :  { %597 = vmatpush.bf16.msra.mxu2 %v2983_v39  ;;  %v4580_v56 = vld [vmem:[#allocation7 + $0x74] sm:$0xf0]  ;;  %v4578_v57 = vld [vmem:[#allocation7 + $0x6c] sm:$0xf]  ;;  %v2952_v58 = vld [vmem:[#allocation7 + $0x78] sm:$0xf0]  ;;  %v2947_v60 = vor.u32 %v4577_v53, %v2944_v54 }
  0x24   :  { %610 = vmatpush.bf16.msra.mxu3 %v2987_v40  ;;  %v2926_v61 = vld [vmem:[#allocation7 + $0x40] sm:$0xf]  ;;  %v4575_v62 = vld [vmem:[#allocation7 + $0x4c] sm:$0xf0]  ;;  %v2951_v63 = vor.u32 %v4580_v56, %v2950_v55  ;;  %v2955_v0 = vor.u32 %v4578_v57, %v2952_v58  ;;  %v4573_v1 = vld [vmem:[#allocation7 + $0x44] sm:$0xf] }
  0x25   :  { %v2928_v2 = vld [vmem:[#allocation7 + $0x50] sm:$0xf0]  ;;  %v2934_v3 = vld [vmem:[#allocation7 + $0x48] sm:$0xf]  ;;  %v4576_v4 = vld [vmem:[#allocation7 + $0x54] sm:$0xf0]  ;;  %v2927_v7 = vor.u32 %v4575_v62, %v2926_v61 }
  0x26   :  { %572 = vmatpush.bf16.msra.mxu0 %v2959_v47  ;;  %585 = vmatpush.bf16.msra.mxu1 %v2963_v48  ;;  %v4574_v5 = vld [vmem:[#allocation7 + $0x4c] sm:$0xf]  ;;  %v2936_v6 = vld [vmem:[#allocation7 + $0x58] sm:$0xf0]  ;;  %v2931_v8 = vor.u32 %v4573_v1, %v2928_v2  ;;  %v2910_v9 = vld [vmem:[#allocation7 + $0x20] sm:$0xf]  ;;  %v2935_v11 = vor.u32 %v4576_v4, %v2934_v3 }
  0x27   :  { %598 = vmatpush.bf16.msra.mxu2 %v2967_v51  ;;  %v4571_v10 = vld [vmem:[#allocation7 + $0x2c] sm:$0xf0]  ;;  %v2939_v12 = vor.u32 %v4574_v5, %v2936_v6  ;;  %v4569_v13 = vld [vmem:[#allocation7 + $0x24] sm:$0xf]  ;;  %v2912_v14 = vld [vmem:[#allocation7 + $0x30] sm:$0xf0] }
  0x28   :  { %611 = vmatpush.bf16.msra.mxu3 %v2971_v52  ;;  %v2918_v15 = vld [vmem:[#allocation7 + $0x28] sm:$0xf]  ;;  %v4572_v16 = vld [vmem:[#allocation7 + $0x34] sm:$0xf0]  ;;  %v4570_v17 = vld [vmem:[#allocation7 + $0x2c] sm:$0xf]  ;;  %v2911_v19 = vor.u32 %v4571_v10, %v2910_v9  ;;  %v2915_v22 = vor.u32 %v4569_v13, %v2912_v14 }
  0x29   :  { %v2920_v18 = vld [vmem:[#allocation7 + $0x38] sm:$0xf0]  ;;  %v2894_v20 = vld [vmem:[#allocation7] sm:$0xf]  ;;  %v4567_v21 = vld [vmem:[#allocation7 + $0xc] sm:$0xf0]  ;;  %v2919_v26 = vor.u32 %v4572_v16, %v2918_v15 }
  0x2a   :  { %573 = vmatpush.bf16.msra.mxu0 %v2943_v59  ;;  %586 = vmatpush.bf16.msra.mxu1 %v2947_v60  ;;  %v4565_v23 = vld [vmem:[#allocation7 + $0x4] sm:$0xf]  ;;  %v2896_v24 = vld [vmem:[#allocation7 + $0x10] sm:$0xf0]  ;;  %v2902_v25 = vld [vmem:[#allocation7 + $0x8] sm:$0xf]  ;;  %v2923_v27 = vor.u32 %v4570_v17, %v2920_v18  ;;  %v2895_v34 = vor.u32 %v4567_v21, %v2894_v20 }
  0x2b   :  { %599 = vmatpush.bf16.msra.mxu2 %v2951_v63  ;;  %v4568_v28 = vld [vmem:[#allocation7 + $0x14] sm:$0xf0]  ;;  %v3142_v29 = vld [vmem:[#allocation5 + $0xe0] sm:$0xf]  ;;  %v4339_v30 = vld [vmem:[#allocation5 + $0xec] sm:$0xf0]  ;;  %v2899_v38 = vor.u32 %v4565_v23, %v2896_v24 }
  0x2c   :  { %612 = vmatpush.bf16.msra.mxu3 %v2955_v0  ;;  %v4566_v31 = vld [vmem:[#allocation7 + $0xc] sm:$0xf]  ;;  %v2904_v32 = vld [vmem:[#allocation7 + $0x18] sm:$0xf0]  ;;  %v3270_v33 = vld [vmem:[#allocation5 + $0x1e0] sm:$0xf]  ;;  %v3143_v39 = vor.u32 %v4339_v30, %v3142_v29  ;;  %v2903_v42 = vor.u32 %v4568_v28, %v2902_v25 }
  0x2d   :  { %v4371_v35 = vld [vmem:[#allocation5 + $0x1ec] sm:$0xf0]  ;;  %v3398_v36 = vld [vmem:[#allocation5 + $0x2e0] sm:$0xf]  ;;  %v2907_v43 = vor.u32 %v4566_v31, %v2904_v32  ;;  %vm2882_vm10 = vcmask 7168  }
  0x2e   :  { %574 = vmatpush.bf16.msra.mxu0 %v2927_v7  ;;  %587 = vmatpush.bf16.msra.mxu1 %v2931_v8  ;;  %v4403_v37 = vld [vmem:[#allocation5 + $0x2ec] sm:$0xf0]  ;;  %v3526_v40 = vld [vmem:[#allocation5 + $0x3e0] sm:$0xf]  ;;  %v3271_v46 = vor.u32 %v4371_v35, %v3270_v33 }
  0x2f   :  { %600 = vmatpush.bf16.msra.mxu2 %v2935_v11  ;;  %v4435_v41 = vld [vmem:[#allocation5 + $0x3ec] sm:$0xf0]  ;;  %v3126_v44 = vld [vmem:[#allocation5 + $0xc0] sm:$0xf]  ;;  %v3399_v47 = vor.u32 %v4403_v37, %v3398_v36 }
  0x30   :  { %613 = vmatpush.bf16.msra.mxu3 %v2939_v12  ;;  %v4335_v45 = vld [vmem:[#allocation5 + $0xcc] sm:$0xf0]  ;;  %v3254_v48 = vld [vmem:[#allocation5 + $0x1c0] sm:$0xf]  ;;  %v3527_v49 = vor.u32 %v4435_v41, %v3526_v40 }
  0x31   :  { %v4367_v50 = vld [vmem:[#allocation5 + $0x1cc] sm:$0xf0]  ;;  %v3382_v51 = vld [vmem:[#allocation5 + $0x2c0] sm:$0xf]  ;;  %v3127_v53 = vor.u32 %v4335_v45, %v3126_v44 }
  0x32   :  { %575 = vmatpush.bf16.msra.mxu0 %v2911_v19  ;;  %588 = vmatpush.bf16.msra.mxu1 %v2915_v22  ;;  %v4399_v52 = vld [vmem:[#allocation5 + $0x2cc] sm:$0xf0]  ;;  %v3510_v54 = vld [vmem:[#allocation5 + $0x3c0] sm:$0xf]  ;;  %v3255_v58 = vor.u32 %v4367_v50, %v3254_v48 }
  0x33   :  { %601 = vmatpush.bf16.msra.mxu2 %v2919_v26  ;;  %v4431_v55 = vld [vmem:[#allocation5 + $0x3cc] sm:$0xf0]  ;;  %v3110_v56 = vld [vmem:[#allocation5 + $0xa0] sm:$0xf]  ;;  %v3383_v59 = vor.u32 %v4399_v52, %v3382_v51 }
  0x34   :  { %614 = vmatpush.bf16.msra.mxu3 %v2923_v27  ;;  %v4331_v57 = vld [vmem:[#allocation5 + $0xac] sm:$0xf0]  ;;  %v3238_v60 = vld [vmem:[#allocation5 + $0x1a0] sm:$0xf]  ;;  %v3511_v61 = vor.u32 %v4431_v55, %v3510_v54 }
  0x35   :  { %v4363_v62 = vld [vmem:[#allocation5 + $0x1ac] sm:$0xf0]  ;;  %v3366_v63 = vld [vmem:[#allocation5 + $0x2a0] sm:$0xf]  ;;  %v3111_v1 = vor.u32 %v4331_v57, %v3110_v56 }
  0x36   :  { %576 = vmatpush.bf16.msra.mxu0 %v2895_v34  ;;  %589 = vmatpush.bf16.msra.mxu1 %v2899_v38  ;;  %v4395_v0 = vld [vmem:[#allocation5 + $0x2ac] sm:$0xf0]  ;;  %v3494_v2 = vld [vmem:[#allocation5 + $0x3a0] sm:$0xf]  ;;  %v3239_v6 = vor.u32 %v4363_v62, %v3238_v60 }
  0x37   :  { %602 = vmatpush.bf16.msra.mxu2 %v2903_v42  ;;  %v4427_v3 = vld [vmem:[#allocation5 + $0x3ac] sm:$0xf0]  ;;  %v3094_v4 = vld [vmem:[#allocation5 + $0x80] sm:$0xf]  ;;  %v3367_v7 = vor.u32 %v4395_v0, %v3366_v63 }
  0x38   :  { %615 = vmatpush.bf16.msra.mxu3 %v2907_v43  ;;  %v4327_v5 = vld [vmem:[#allocation5 + $0x8c] sm:$0xf0]  ;;  %v3222_v8 = vld [vmem:[#allocation5 + $0x180] sm:$0xf]  ;;  %v3495_v9 = vor.u32 %v4427_v3, %v3494_v2  ;;  %v368_v3 = vlaneseq }
  0x39   :  { %v4359_v10 = vld [vmem:[#allocation5 + $0x18c] sm:$0xf0]  ;;  %v3350_v11 = vld [vmem:[#allocation5 + $0x280] sm:$0xf]  ;;  %v3095_v13 = vor.u32 %v4327_v5, %v3094_v4 }
  0x3a   :  { %1901 = vmatpush.bf16.msrb.mxu0 %v3143_v39  ;;  %1914 = vmatpush.bf16.msrb.mxu1 %v3271_v46  ;;  %v4391_v12 = vld [vmem:[#allocation5 + $0x28c] sm:$0xf0]  ;;  %v3478_v14 = vld [vmem:[#allocation5 + $0x380] sm:$0xf]  ;;  %v3223_v18 = vor.u32 %v4359_v10, %v3222_v8  ;;  %v369_v4 = vand.u32 127, %v368_v3 }
  0x3b   :  { %1927 = vmatpush.bf16.msrb.mxu2 %v3399_v47  ;;  %v4423_v15 = vld [vmem:[#allocation5 + $0x38c] sm:$0xf0]  ;;  %v3078_v16 = vld [vmem:[#allocation5 + $0x60] sm:$0xf]  ;;  %v3351_v19 = vor.u32 %v4391_v12, %v3350_v11 }
  0x3c   :  { %1940 = vmatpush.bf16.msrb.mxu3 %v3527_v49  ;;  %v4323_v17 = vld [vmem:[#allocation5 + $0x6c] sm:$0xf0]  ;;  %v3206_v20 = vld [vmem:[#allocation5 + $0x160] sm:$0xf]  ;;  %v3479_v21 = vor.u32 %v4423_v15, %v3478_v14 }
  0x3d   :  { %v4355_v22 = vld [vmem:[#allocation5 + $0x16c] sm:$0xf0]  ;;  %v3334_v23 = vld [vmem:[#allocation5 + $0x260] sm:$0xf]  ;;  %v3079_v25 = vor.u32 %v4323_v17, %v3078_v16 }
  0x3e   :  { %1902 = vmatpush.bf16.msrb.mxu0 %v3127_v53  ;;  %1915 = vmatpush.bf16.msrb.mxu1 %v3255_v58  ;;  %v4387_v24 = vld [vmem:[#allocation5 + $0x26c] sm:$0xf0]  ;;  %v3462_v26 = vld [vmem:[#allocation5 + $0x360] sm:$0xf]  ;;  %v3207_v30 = vor.u32 %v4355_v22, %v3206_v20 }
  0x3f   :  { %1928 = vmatpush.bf16.msrb.mxu2 %v3383_v59  ;;  %v4419_v27 = vld [vmem:[#allocation5 + $0x36c] sm:$0xf0]  ;;  %v3062_v28 = vld [vmem:[#allocation5 + $0x40] sm:$0xf]  ;;  %v3335_v31 = vor.u32 %v4387_v24, %v3334_v23  ;;  %v4788_v23 = vmov 1.0|1.0  }
  0x40   :  { %1941 = vmatpush.bf16.msrb.mxu3 %v3511_v61  ;;  %v4319_v29 = vld [vmem:[#allocation5 + $0x4c] sm:$0xf0]  ;;  %v3190_v32 = vld [vmem:[#allocation5 + $0x140] sm:$0xf]  ;;  %v3463_v33 = vor.u32 %v4419_v27, %v3462_v26 }
  0x41   :  { %v4351_v34 = vld [vmem:[#allocation5 + $0x14c] sm:$0xf0]  ;;  %v3318_v35 = vld [vmem:[#allocation5 + $0x240] sm:$0xf]  ;;  %v3063_v37 = vor.u32 %v4319_v29, %v3062_v28 }
  0x42   :  { %1903 = vmatpush.bf16.msrb.mxu0 %v3111_v1  ;;  %1916 = vmatpush.bf16.msrb.mxu1 %v3239_v6  ;;  %v4383_v36 = vld [vmem:[#allocation5 + $0x24c] sm:$0xf0]  ;;  %v3446_v38 = vld [vmem:[#allocation5 + $0x340] sm:$0xf]  ;;  %v3191_v42 = vor.u32 %v4351_v34, %v3190_v32 }
  0x43   :  { %1929 = vmatpush.bf16.msrb.mxu2 %v3367_v7  ;;  %v4415_v39 = vld [vmem:[#allocation5 + $0x34c] sm:$0xf0]  ;;  %v3046_v40 = vld [vmem:[#allocation5 + $0x20] sm:$0xf]  ;;  %v3319_v43 = vor.u32 %v4383_v36, %v3318_v35 }
  0x44   :  { %1942 = vmatpush.bf16.msrb.mxu3 %v3495_v9  ;;  %v4315_v41 = vld [vmem:[#allocation5 + $0x2c] sm:$0xf0]  ;;  %v3174_v44 = vld [vmem:[#allocation5 + $0x120] sm:$0xf]  ;;  %v3447_v45 = vor.u32 %v4415_v39, %v3446_v38 }
  0x45   :  { %v4347_v46 = vld [vmem:[#allocation5 + $0x12c] sm:$0xf0]  ;;  %v3302_v47 = vld [vmem:[#allocation5 + $0x220] sm:$0xf]  ;;  %v3047_v49 = vor.u32 %v4315_v41, %v3046_v40 }
  0x46   :  { %1904 = vmatpush.bf16.msrb.mxu0 %v3095_v13  ;;  %1917 = vmatpush.bf16.msrb.mxu1 %v3223_v18  ;;  %v4379_v48 = vld [vmem:[#allocation5 + $0x22c] sm:$0xf0]  ;;  %v3430_v50 = vld [vmem:[#allocation5 + $0x320] sm:$0xf]  ;;  %v3175_v52 = vor.u32 %v4347_v46, %v3174_v44 }
  0x47   :  { %1930 = vmatpush.bf16.msrb.mxu2 %v3351_v19  ;;  %v4411_v51 = vld [vmem:[#allocation5 + $0x32c] sm:$0xf0]  ;;  %v3303_v53 = vor.u32 %v4379_v48, %v3302_v47  ;;  %v3030_v55 = vld [vmem:[#allocation5] sm:$0xf] }
  0x48   :  { %1943 = vmatpush.bf16.msrb.mxu3 %v3479_v21  ;;  %v3431_v54 = vor.u32 %v4411_v51, %v3430_v50  ;;  %v4311_v56 = vld [vmem:[#allocation5 + $0xc] sm:$0xf0]  ;;  %v3158_v57 = vld [vmem:[#allocation5 + $0x100] sm:$0xf] }
  0x49   :  { %v3031_v58 = vor.u32 %v4311_v56, %v3030_v55  ;;  %v4343_v59 = vld [vmem:[#allocation5 + $0x10c] sm:$0xf0]  ;;  %v3286_v60 = vld [vmem:[#allocation5 + $0x200] sm:$0xf] }
  0x4a   :  { %1905 = vmatpush.bf16.msrb.mxu0 %v3079_v25  ;;  %1918 = vmatpush.bf16.msrb.mxu1 %v3207_v30  ;;  %v4375_v61 = vld [vmem:[#allocation5 + $0x20c] sm:$0xf0]  ;;  %v3159_v62 = vor.u32 %v4343_v59, %v3158_v57  ;;  %v3414_v0 = vld [vmem:[#allocation5 + $0x300] sm:$0xf] }
  0x4b   :  { %1931 = vmatpush.bf16.msrb.mxu2 %v3335_v31  ;;  %v3287_v63 = vor.u32 %v4375_v61, %v3286_v60  ;;  %v4407_v1 = vld [vmem:[#allocation5 + $0x30c] sm:$0xf0]  ;;  %v3654_v5 = vld [vmem:[#allocation5 + $0x4e0] sm:$0xf] }
  0x4c   :  { %1944 = vmatpush.bf16.msrb.mxu3 %v3463_v33  ;;  %v3415_v2 = vor.u32 %v4407_v1, %v3414_v0  ;;  %v4467_v6 = vld [vmem:[#allocation5 + $0x4ec] sm:$0xf0]  ;;  %v3782_v7 = vld [vmem:[#allocation5 + $0x5e0] sm:$0xf] }
  0x4d   :  { %v4499_v8 = vld [vmem:[#allocation5 + $0x5ec] sm:$0xf0]  ;;  %v3910_v9 = vld [vmem:[#allocation5 + $0x6e0] sm:$0xf]  ;;  %v3655_v14 = vor.u32 %v4467_v6, %v3654_v5 }
  0x4e   :  { %1906 = vmatpush.bf16.msrb.mxu0 %v3063_v37  ;;  %1919 = vmatpush.bf16.msrb.mxu1 %v3191_v42  ;;  %v4531_v10 = vld [vmem:[#allocation5 + $0x6ec] sm:$0xf0]  ;;  %v4038_v11 = vld [vmem:[#allocation5 + $0x7e0] sm:$0xf]  ;;  %v3783_v15 = vor.u32 %v4499_v8, %v3782_v7 }
  0x4f   :  { %1932 = vmatpush.bf16.msrb.mxu2 %v3319_v43  ;;  %v4563_v12 = vld [vmem:[#allocation5 + $0x7ec] sm:$0xf0]  ;;  %v3638_v16 = vld [vmem:[#allocation5 + $0x4c0] sm:$0xf]  ;;  %v3911_v19 = vor.u32 %v4531_v10, %v3910_v9 }
  0x50   :  { %1945 = vmatpush.bf16.msrb.mxu3 %v3447_v45  ;;  %v4463_v17 = vld [vmem:[#allocation5 + $0x4cc] sm:$0xf0]  ;;  %v3766_v18 = vld [vmem:[#allocation5 + $0x5c0] sm:$0xf]  ;;  %v4039_v20 = vor.u32 %v4563_v12, %v4038_v11 }
  0x51   :  { %v4495_v21 = vld [vmem:[#allocation5 + $0x5cc] sm:$0xf0]  ;;  %v3894_v22 = vld [vmem:[#allocation5 + $0x6c0] sm:$0xf]  ;;  %v3639_v27 = vor.u32 %v4463_v17, %v3638_v16 }
  0x52   :  { %1907 = vmatpush.bf16.msrb.mxu0 %v3047_v49  ;;  %1920 = vmatpush.bf16.msrb.mxu1 %v3175_v52  ;;  %v4527_v24 = vld [vmem:[#allocation5 + $0x6cc] sm:$0xf0]  ;;  %v4022_v25 = vld [vmem:[#allocation5 + $0x7c0] sm:$0xf]  ;;  %v3767_v28 = vor.u32 %v4495_v21, %v3766_v18 }
  0x53   :  { %1933 = vmatpush.bf16.msrb.mxu2 %v3303_v53  ;;  %v4559_v26 = vld [vmem:[#allocation5 + $0x7cc] sm:$0xf0]  ;;  %v3622_v29 = vld [vmem:[#allocation5 + $0x4a0] sm:$0xf]  ;;  %v3895_v31 = vor.u32 %v4527_v24, %v3894_v22  ;;  %v96_v53 = vld [vmem:[#allocation3 + $0x8] sm:$0xff] }
  0x54   :  { %1946 = vmatpush.bf16.msrb.mxu3 %v3431_v54  ;;  %v4459_v30 = vld [vmem:[#allocation5 + $0x4ac] sm:$0xf0]  ;;  %v4023_v32 = vor.u32 %v4559_v26, %v4022_v25  ;;  %v3750_v33 = vld [vmem:[#allocation5 + $0x5a0] sm:$0xf] }
  0x55   :  { %v4491_v34 = vld [vmem:[#allocation5 + $0x5ac] sm:$0xf0]  ;;  %v3878_v35 = vld [vmem:[#allocation5 + $0x6a0] sm:$0xf]  ;;  %v3623_v39 = vor.u32 %v4459_v30, %v3622_v29 }
  0x56   :  { %1908 = vmatpush.bf16.msrb.mxu0 %v3031_v58  ;;  %1921 = vmatpush.bf16.msrb.mxu1 %v3159_v62  ;;  %v4523_v36 = vld [vmem:[#allocation5 + $0x6ac] sm:$0xf0]  ;;  %v4006_v37 = vld [vmem:[#allocation5 + $0x7a0] sm:$0xf]  ;;  %v3751_v40 = vor.u32 %v4491_v34, %v3750_v33  ;;  %v98_v58 = vld [vmem:[#allocation3 + $0x18] sm:$0xff] }
  0x57   :  { %1934 = vmatpush.bf16.msrb.mxu2 %v3287_v63  ;;  %v4555_v38 = vld [vmem:[#allocation5 + $0x7ac] sm:$0xf0]  ;;  %v3606_v41 = vld [vmem:[#allocation5 + $0x480] sm:$0xf]  ;;  %v3879_v43 = vor.u32 %v4523_v36, %v3878_v35  ;;  %v4863_v6 = vpack.c.bf16 %v98_v58, %v98_v58 }
  0x58   :  { %1947 = vmatpush.bf16.msrb.mxu3 %v3415_v2  ;;  %v4455_v42 = vld [vmem:[#allocation5 + $0x48c] sm:$0xf0]  ;;  %v4007_v44 = vor.u32 %v4555_v38, %v4006_v37  ;;  %v3734_v45 = vld [vmem:[#allocation5 + $0x580] sm:$0xf] }
  0x59   :  { %v4487_v46 = vld [vmem:[#allocation5 + $0x58c] sm:$0xf0]  ;;  %v3862_v47 = vld [vmem:[#allocation5 + $0x680] sm:$0xf]  ;;  %v3607_v54 = vor.u32 %v4455_v42, %v3606_v41 }
  0x5a   :  { %v4519_v48 = vld [vmem:[#allocation5 + $0x68c] sm:$0xf0]  ;;  %v3990_v49 = vld [vmem:[#allocation5 + $0x780] sm:$0xf]  ;;  %v3735_v55 = vor.u32 %v4487_v46, %v3734_v45  ;;  %v4369_v45 = vld [vmem:[#allocation5 + $0x1e4] sm:$0xf] }
  0x5b   :  { %v4551_v50 = vld [vmem:[#allocation5 + $0x78c] sm:$0xf0]  ;;  %v95_v51 = vld [vmem:[#allocation3] sm:$0xff]  ;;  %v3863_v59 = vor.u32 %v4519_v48, %v3862_v47  ;;  %v3272_v46 = vld [vmem:[#allocation5 + $0x1f0] sm:$0xf0] }
  0x5c   :  { %v97_v52 = vld [vmem:[#allocation3 + $0x10] sm:$0xff]  ;;  %v3590_v56 = vld [vmem:[#allocation5 + $0x460] sm:$0xf]  ;;  %v3991_v60 = vor.u32 %v4551_v50, %v3990_v49  ;;  %v4857_v0 = vpack.c.bf16 %v95_v51, %v95_v51  ;;  %v4401_v47 = vld [vmem:[#allocation5 + $0x2e4] sm:$0xf] }
  0x5d   :  { %v4451_v57 = vld [vmem:[#allocation5 + $0x46c] sm:$0xf0]  ;;  %v3718_v61 = vld [vmem:[#allocation5 + $0x560] sm:$0xf]  ;;  %v4861_v5 = vpack.c.bf16 %v97_v52, %v97_v52  ;;  %v3400_v50 = vld [vmem:[#allocation5 + $0x2f0] sm:$0xf0] }
  0x5e   :  { %v4483_v62 = vld [vmem:[#allocation5 + $0x56c] sm:$0xf0]  ;;  %v3846_v63 = vld [vmem:[#allocation5 + $0x660] sm:$0xf]  ;;  %v3591_v7 = vor.u32 %v4451_v57, %v3590_v56  ;;  %v4433_v51 = vld [vmem:[#allocation5 + $0x3e4] sm:$0xf] }
  0x5f   :  { %v4515_v1 = vld [vmem:[#allocation5 + $0x66c] sm:$0xf0]  ;;  %v3974_v2 = vld [vmem:[#allocation5 + $0x760] sm:$0xf]  ;;  %v3719_v8 = vor.u32 %v4483_v62, %v3718_v61  ;;  %v3528_v52 = vld [vmem:[#allocation5 + $0x3f0] sm:$0xf0] }
  0x60   :  { %v4547_v3 = vld [vmem:[#allocation5 + $0x76c] sm:$0xf0]  ;;  %v3574_v9 = vld [vmem:[#allocation5 + $0x440] sm:$0xf]  ;;  %v3847_v11 = vor.u32 %v4515_v1, %v3846_v63  ;;  %v4333_v57 = vld [vmem:[#allocation5 + $0xc4] sm:$0xf]  ;;  %v3403_v63 = vor.u32 %v4401_v47, %v3400_v50  ;;  %v3531_v1 = vor.u32 %v4433_v51, %v3528_v52 }
  0x61   :  { %v4447_v10 = vld [vmem:[#allocation5 + $0x44c] sm:$0xf0]  ;;  %v3975_v12 = vor.u32 %v4547_v3, %v3974_v2  ;;  %v3958_v17 = vld [vmem:[#allocation5 + $0x740] sm:$0xf]  ;;  %v100_v61 = vld [vmem:[#allocation3 + $0x28] sm:$0xff] }
  0x62   :  { %v4511_v16 = vld [vmem:[#allocation5 + $0x64c] sm:$0xf0]  ;;  %v3558_v21 = vld [vmem:[#allocation5 + $0x420] sm:$0xf]  ;;  %v102_v62 = vld [vmem:[#allocation3 + $0x38] sm:$0xff] }
  0x63   :  { %v4543_v18 = vld [vmem:[#allocation5 + $0x74c] sm:$0xf0]  ;;  %v3686_v25 = vld [vmem:[#allocation5 + $0x520] sm:$0xf]  ;;  %v4365_v2 = vld [vmem:[#allocation5 + $0x1c4] sm:$0xf] }
  0x64   :  { %v4443_v22 = vld [vmem:[#allocation5 + $0x42c] sm:$0xf0]  ;;  %v3959_v24 = vor.u32 %v4543_v18, %v3958_v17  ;;  %v3942_v29 = vld [vmem:[#allocation5 + $0x720] sm:$0xf]  ;;  %v3256_v3 = vld [vmem:[#allocation5 + $0x1d0] sm:$0xf0] }
  0x65   :  { %v4475_v26 = vld [vmem:[#allocation5 + $0x52c] sm:$0xf0]  ;;  %v3670_v35 = vld [vmem:[#allocation5 + $0x500] sm:$0xf]  ;;  %v4329_v17 = vld [vmem:[#allocation5 + $0xa4] sm:$0xf] }
  0x66   :  { %v4539_v30 = vld [vmem:[#allocation5 + $0x72c] sm:$0xf0]  ;;  %v3687_v33 = vor.u32 %v4475_v26, %v3686_v25  ;;  %v3926_v41 = vld [vmem:[#allocation5 + $0x700] sm:$0xf]  ;;  %v3112_v18 = vld [vmem:[#allocation5 + $0xb0] sm:$0xf0] }
  0x67   :  { %v4439_v34 = vld [vmem:[#allocation5 + $0x40c] sm:$0xf0]  ;;  %v3943_v38 = vor.u32 %v4539_v30, %v3942_v29  ;;  %v4425_v25 = vld [vmem:[#allocation5 + $0x3a4] sm:$0xf]  ;;  %v3496_v26 = vld [vmem:[#allocation5 + $0x3b0] sm:$0xf0] }
  0x68   :  { %v4471_v36 = vld [vmem:[#allocation5 + $0x50c] sm:$0xf0]  ;;  %v4325_v29 = vld [vmem:[#allocation5 + $0x84] sm:$0xf]  ;;  %v3096_v30 = vld [vmem:[#allocation5 + $0x90] sm:$0xf0] }
  0x69   :  { %v4535_v42 = vld [vmem:[#allocation5 + $0x70c] sm:$0xf0]  ;;  %v3671_v49 = vor.u32 %v4471_v36, %v3670_v35  ;;  %v4389_v35 = vld [vmem:[#allocation5 + $0x284] sm:$0xf]  ;;  %v3352_v36 = vld [vmem:[#allocation5 + $0x290] sm:$0xf0] }
  0x6a   :  { %v101_v56 = vld [vmem:[#allocation3 + $0x30] sm:$0xff]  ;;  %v4385_v47 = vld [vmem:[#allocation5 + $0x264] sm:$0xf] }
  0x6b   :  { %v3464_v50 = vld [vmem:[#allocation5 + $0x370] sm:$0xf0] }
  0x8a   :  { %v372_v13 = vpop.permute.xlu0 %371 }
  0x8b   :  { %vm373_vm0 = vcmp.eq.s32.totalorder %v369_v4, %v372_v13  ;;  %v4859_v4 = vpack.c.bf16 %v96_v53, %v96_v53  ;;  %v3702_v13 = vld [vmem:[#allocation5 + $0x540] sm:$0xf] }
  0x8c   :  { %vm3020_vm1 = vmpackc.low %vm373_vm0, %vm373_vm0 }
  0x8d   :  { %3021 = vmatmul.msk.bf16.vlgmr.msra.gmra.mxu0 %vm3020_vm1, %v4788_v23  ;;  %3023 = vmatmul.msk.bf16.vlgmr.msra.gmra.mxu1 %vm3020_vm1, %v4788_v23 }
  0x8e   :  { %3025 = vmatmul.msk.bf16.vlgmr.msra.gmra.mxu2 %vm3020_vm1, %v4788_v23  ;;  %3027 = vmatmul.msk.bf16.vlgmr.msra.gmra.mxu3 %vm3020_vm1, %v4788_v23 }
  0x8f   :  { %1953 = vmatpush.bf16.msra.mxu0 %v3655_v14  ;;  %1966 = vmatpush.bf16.msra.mxu1 %v3783_v15  ;;  %v4479_v14 = vld [vmem:[#allocation5 + $0x54c] sm:$0xf0]  ;;  %v3830_v15 = vld [vmem:[#allocation5 + $0x640] sm:$0xf] }
  0x90   :  { %1979 = vmatpush.bf16.msra.mxu2 %v3911_v19  ;;  %1992 = vmatpush.bf16.msra.mxu3 %v4039_v20  ;;  %v3575_v19 = vor.u32 %v4447_v10, %v3574_v9  ;;  %v3703_v20 = vor.u32 %v4479_v14, %v3702_v13  ;;  %v3831_v23 = vor.u32 %v4511_v16, %v3830_v15  ;;  %v3384_v10 = vld [vmem:[#allocation5 + $0x2d0] sm:$0xf0] }
  0x91   :  { %v4871_v9 = vpack.c.bf16 %v101_v56, %v101_v56  ;;  %v4873_v13 = vpack.c.bf16 %v100_v61, %v100_v61  ;;  %v4875_v14 = vpack.c.bf16 %v102_v62, %v102_v62  ;;  %v3259_v16 = vor.u32 %v4365_v2, %v3256_v3  ;;  %v4413_v61 = vld [vmem:[#allocation5 + $0x344] sm:$0xf]  ;;  %v3448_v62 = vld [vmem:[#allocation5 + $0x350] sm:$0xf0] }
  0x92   :  { %v4313_v2 = vld [vmem:[#allocation5 + $0x24] sm:$0xf]  ;;  %v3048_v3 = vld [vmem:[#allocation5 + $0x30] sm:$0xf0] }
  0x93   :  { %1954 = vmatpush.bf16.msra.mxu0 %v3639_v27  ;;  %1967 = vmatpush.bf16.msra.mxu1 %v3767_v28  ;;  %v3814_v27 = vld [vmem:[#allocation5 + $0x620] sm:$0xf]  ;;  %v4507_v28 = vld [vmem:[#allocation5 + $0x62c] sm:$0xf0] }
  0x94   :  { %1980 = vmatpush.bf16.msra.mxu2 %v3895_v31  ;;  %1993 = vmatpush.bf16.msra.mxu3 %v4023_v32  ;;  %v3542_v31 = vld [vmem:[#allocation5 + $0x400] sm:$0xf]  ;;  %v3559_v32 = vor.u32 %v4443_v22, %v3558_v21  ;;  %v3815_v37 = vor.u32 %v4507_v28, %v3814_v27  ;;  %v4361_v21 = vld [vmem:[#allocation5 + $0x1a4] sm:$0xf]  ;;  %v3240_v22 = vld [vmem:[#allocation5 + $0x1b0] sm:$0xf0]  ;;  %v3115_v27 = vor.u32 %v4329_v17, %v3112_v18 }
  0x95   :  { %v3543_v48 = vor.u32 %v4439_v34, %v3542_v31  ;;  %v3243_v28 = vor.u32 %v4361_v21, %v3240_v22  ;;  %v3224_v34 = vld [vmem:[#allocation5 + $0x190] sm:$0xf0]  ;;  %v4409_v17 = vld [vmem:[#allocation5 + $0x324] sm:$0xf] }
  0x96   :  { %v3432_v18 = vld [vmem:[#allocation5 + $0x330] sm:$0xf0] }
  0x97   :  { %1955 = vmatpush.bf16.msra.mxu0 %v3623_v39  ;;  %1968 = vmatpush.bf16.msra.mxu1 %v3751_v40  ;;  %v3798_v39 = vld [vmem:[#allocation5 + $0x600] sm:$0xf]  ;;  %v4503_v40 = vld [vmem:[#allocation5 + $0x60c] sm:$0xf0]  ;;  %v3032_v22 = vld [vmem:[#allocation5 + $0x10] sm:$0xf0] }
  0x98   :  { %1981 = vmatpush.bf16.msra.mxu2 %v3879_v43  ;;  %1994 = vmatpush.bf16.msra.mxu3 %v4007_v44  ;;  %v4337_v43 = vld [vmem:[#allocation5 + $0xe4] sm:$0xf]  ;;  %v3144_v44 = vld [vmem:[#allocation5 + $0xf0] sm:$0xf0]  ;;  %v3799_v53 = vor.u32 %v4503_v40, %v3798_v39  ;;  %v3099_v39 = vor.u32 %v4325_v29, %v3096_v30 }
  0x99   :  { %v3147_v58 = vor.u32 %v4337_v43, %v3144_v44  ;;  %v3355_v43 = vor.u32 %v4389_v35, %v3352_v36  ;;  %v4405_v29 = vld [vmem:[#allocation5 + $0x304] sm:$0xf]  ;;  %v3416_v30 = vld [vmem:[#allocation5 + $0x310] sm:$0xf0] }
  0x9a   :  { %v4529_v35 = vld [vmem:[#allocation5 + $0x6e4] sm:$0xf] }
  0x9b   :  { %1956 = vmatpush.bf16.msra.mxu0 %v3607_v54  ;;  %1969 = vmatpush.bf16.msra.mxu1 %v3735_v55  ;;  %v3927_v54 = vor.u32 %v4535_v42, %v3926_v41  ;;  %v99_v55 = vld [vmem:[#allocation3 + $0x20] sm:$0xff]  ;;  %v3080_v42 = vld [vmem:[#allocation5 + $0x70] sm:$0xf0] }
  0x9c   :  { %1982 = vmatpush.bf16.msra.mxu2 %v3863_v59  ;;  %1995 = vmatpush.bf16.msra.mxu3 %v3991_v60  ;;  %v3275_v59 = vor.u32 %v4369_v45, %v3272_v46  ;;  %v3128_v60 = vld [vmem:[#allocation5 + $0xd0] sm:$0xf0]  ;;  %v4321_v41 = vld [vmem:[#allocation5 + $0x64] sm:$0xf] }
  0x9d   :  { %1909 = vmatmul.bf16.vlgmr.msrb.gmra.mxu0 %v4857_v0  ;;  %1922 = vmatmul.bf16.vlgmr.msrb.gmra.mxu1 %v4859_v4  ;;  %v3131_v15 = vor.u32 %v4333_v57, %v3128_v60  ;;  %v4353_v45 = vld [vmem:[#allocation5 + $0x164] sm:$0xf]  ;;  %v3208_v46 = vld [vmem:[#allocation5 + $0x170] sm:$0xf0]  ;;  %v3083_v51 = vor.u32 %v4321_v41, %v3080_v42  ;;  %v3419_v42 = vor.u32 %v4405_v29, %v3416_v30 }
  0x9e   :  { %1935 = vmatmul.bf16.vlgmr.msrb.gmra.mxu2 %v4861_v5  ;;  %1948 = vmatmul.bf16.vlgmr.msrb.gmra.mxu3 %v4863_v6  ;;  %v3211_v52 = vor.u32 %v4353_v45, %v3208_v46  ;;  %v4349_v57 = vld [vmem:[#allocation5 + $0x144] sm:$0xf]  ;;  %v3320_v60 = vld [vmem:[#allocation5 + $0x250] sm:$0xf0] }
  0x9f   :  { %1957 = vmatpush.bf16.msra.mxu0 %v3591_v7  ;;  %1970 = vmatpush.bf16.msra.mxu1 %v3719_v8  ;;  %v4397_v7 = vld [vmem:[#allocation5 + $0x2c4] sm:$0xf]  ;;  %v4869_v8 = vpack.c.bf16 %v99_v55, %v99_v55  ;;  %v3640_v46 = vld [vmem:[#allocation5 + $0x4d0] sm:$0xf0] }
  0xa0   :  { %1983 = vmatpush.bf16.msra.mxu2 %v3847_v11  ;;  %1996 = vmatpush.bf16.msra.mxu3 %v3975_v12  ;;  %v4429_v11 = vld [vmem:[#allocation5 + $0x3c4] sm:$0xf]  ;;  %v3512_v12 = vld [vmem:[#allocation5 + $0x3d0] sm:$0xf0] }
  0xa1   :  { %v4461_v45 = vld [vmem:[#allocation5 + $0x4c4] sm:$0xf]  ;;  %v3720_v30 = vld [vmem:[#allocation5 + $0x570] sm:$0xf0] }
  0xa2   :  { %v4481_v29 = vld [vmem:[#allocation5 + $0x564] sm:$0xf] }
  0xa3   :  { %1958 = vmatpush.bf16.msra.mxu0 %v3575_v19  ;;  %1971 = vmatpush.bf16.msra.mxu1 %v3703_v20  ;;  %v3387_v19 = vor.u32 %v4397_v7, %v3384_v10  ;;  %v3515_v20 = vor.u32 %v4429_v11, %v3512_v12  ;;  %v3451_v10 = vor.u32 %v4413_v61, %v3448_v62  ;;  %v4345_v11 = vld [vmem:[#allocation5 + $0x124] sm:$0xf]  ;;  %v3176_v12 = vld [vmem:[#allocation5 + $0x130] sm:$0xf0] }
  0xa4   :  { %1984 = vmatpush.bf16.msra.mxu2 %v3831_v23  ;;  %1997 = vmatpush.bf16.msra.mxu3 %v3959_v24  ;;  %v4393_v23 = vld [vmem:[#allocation5 + $0x2a4] sm:$0xf]  ;;  %v3368_v24 = vld [vmem:[#allocation5 + $0x2b0] sm:$0xf0]  ;;  %v3179_v21 = vor.u32 %v4345_v11, %v3176_v12 }
  0xa5   :  { %v3371_v31 = vor.u32 %v4393_v23, %v3368_v24  ;;  %v4341_v23 = vld [vmem:[#allocation5 + $0x104] sm:$0xf]  ;;  %v3160_v24 = vld [vmem:[#allocation5 + $0x110] sm:$0xf0] }
  0xa6   :  { %v4489_v61 = vld [vmem:[#allocation5 + $0x5a4] sm:$0xf]  ;;  %v3752_v62 = vld [vmem:[#allocation5 + $0x5b0] sm:$0xf0] }
  0xa7   :  { %1959 = vmatpush.bf16.msra.mxu0 %v3559_v32  ;;  %1972 = vmatpush.bf16.msra.mxu1 %v3687_v33  ;;  %v3499_v32 = vor.u32 %v4425_v25, %v3496_v26  ;;  %v4357_v33 = vld [vmem:[#allocation5 + $0x184] sm:$0xf]  ;;  %v3435_v26 = vor.u32 %v4409_v17, %v3432_v18  ;;  %v3608_v12 = vld [vmem:[#allocation5 + $0x490] sm:$0xf0] }
  0xa8   :  { %1985 = vmatpush.bf16.msra.mxu2 %v3815_v37  ;;  %1998 = vmatpush.bf16.msra.mxu3 %v3943_v38  ;;  %v4421_v37 = vld [vmem:[#allocation5 + $0x384] sm:$0xf]  ;;  %v3480_v38 = vld [vmem:[#allocation5 + $0x390] sm:$0xf0]  ;;  %v3227_v40 = vor.u32 %v4357_v33, %v3224_v34 }
  0xa9   :  { %v3483_v44 = vor.u32 %v4421_v37, %v3480_v38  ;;  %v4497_v33 = vld [vmem:[#allocation5 + $0x5e4] sm:$0xf]  ;;  %v3784_v34 = vld [vmem:[#allocation5 + $0x5f0] sm:$0xf0]  ;;  %v3163_v37 = vor.u32 %v4341_v23, %v3160_v24 }
  0xaa   :  { %v3912_v38 = vld [vmem:[#allocation5 + $0x6f0] sm:$0xf0]  ;;  %v4453_v11 = vld [vmem:[#allocation5 + $0x484] sm:$0xf] }
  0xab   :  { %1960 = vmatpush.bf16.msra.mxu0 %v3543_v48  ;;  %1973 = vmatpush.bf16.msra.mxu1 %v3671_v49  ;;  %v3336_v48 = vld [vmem:[#allocation5 + $0x270] sm:$0xf0]  ;;  %v4417_v49 = vld [vmem:[#allocation5 + $0x364] sm:$0xf]  ;;  %v3611_v23 = vor.u32 %v4453_v11, %v3608_v12 }
  0xac   :  { %1986 = vmatpush.bf16.msra.mxu2 %v3799_v53  ;;  %1999 = vmatpush.bf16.msra.mxu3 %v3927_v54  ;;  %v4317_v53 = vld [vmem:[#allocation5 + $0x44] sm:$0xf]  ;;  %v3064_v54 = vld [vmem:[#allocation5 + $0x50] sm:$0xf0]  ;;  %v3339_v55 = vor.u32 %v4385_v47, %v3336_v48  ;;  %v3467_v56 = vor.u32 %v4417_v49, %v3464_v50  ;;  %v3915_v47 = vor.u32 %v4529_v35, %v3912_v38 }
  0xad   :  { %v4493_v49 = vld [vmem:[#allocation5 + $0x5c4] sm:$0xf]  ;;  %v3768_v50 = vld [vmem:[#allocation5 + $0x5d0] sm:$0xf0] }
  0xae   :  { %1961 = vmatmul.bf16.vlgmr.msra.gmra.mxu0 %v4869_v8  ;;  %1974 = vmatmul.bf16.vlgmr.msra.gmra.mxu1 %v4873_v13  ;;  %v4485_v17 = vld [vmem:[#allocation5 + $0x584] sm:$0xf]  ;;  %v3736_v18 = vld [vmem:[#allocation5 + $0x590] sm:$0xf0] }
  0xaf   :  { %2005 = vmatpush.bf16.msrb.mxu0 %v3147_v58  ;;  %2018 = vmatpush.bf16.msrb.mxu1 %v3275_v59  ;;  %v3192_v58 = vld [vmem:[#allocation5 + $0x150] sm:$0xf0]  ;;  %v4381_v59 = vld [vmem:[#allocation5 + $0x244] sm:$0xf]  ;;  %v3739_v24 = vor.u32 %v4485_v17, %v3736_v18  ;;  %v3278_v17 = vld [vmem:[#allocation5 + $0x1e8] sm:$0xf] }
  0xb0   :  { %2031 = vmatpush.bf16.msrb.mxu2 %v3403_v63  ;;  %2044 = vmatpush.bf16.msrb.mxu3 %v3531_v1  ;;  %v3067_v63 = vor.u32 %v4317_v53, %v3064_v54  ;;  %v3195_v1 = vor.u32 %v4349_v57, %v3192_v58  ;;  %v3323_v7 = vor.u32 %v4381_v59, %v3320_v60  ;;  %v4557_v53 = vld [vmem:[#allocation5 + $0x7c4] sm:$0xf]  ;;  %v4024_v54 = vld [vmem:[#allocation5 + $0x7d0] sm:$0xf0]  ;;  %v4372_v18 = vld [vmem:[#allocation5 + $0x1f4] sm:$0xf0] }
  0xb1   :  { %1987 = vmatmul.bf16.vlgmr.msra.gmra.mxu2 %v4871_v9  ;;  %2000 = vmatmul.bf16.vlgmr.msra.gmra.mxu3 %v4875_v14  ;;  %v4457_v57 = vld [vmem:[#allocation5 + $0x4a4] sm:$0xf]  ;;  %v3624_v58 = vld [vmem:[#allocation5 + $0x4b0] sm:$0xf0]  ;;  %v4027_v60 = vor.u32 %v4557_v53, %v4024_v54 }
  0xb2   :  { %v3576_v38 = vld [vmem:[#allocation5 + $0x450] sm:$0xf0]  ;;  %v4473_v53 = vld [vmem:[#allocation5 + $0x524] sm:$0xf] }
  0xb3   :  { %2006 = vmatpush.bf16.msrb.mxu0 %v3131_v15  ;;  %2019 = vmatpush.bf16.msrb.mxu1 %v3259_v16  ;;  %v4377_v15 = vld [vmem:[#allocation5 + $0x224] sm:$0xf]  ;;  %v3304_v16 = vld [vmem:[#allocation5 + $0x230] sm:$0xf0] }
  0xb4   :  { %2032 = vmatpush.bf16.msrb.mxu2 %v3387_v19  ;;  %2045 = vmatpush.bf16.msrb.mxu3 %v3515_v20  ;;  %v4309_v19 = vld [vmem:[#allocation5 + $0x4] sm:$0xf]  ;;  %v3051_v20 = vor.u32 %v4313_v2, %v3048_v3  ;;  %v3307_v25 = vor.u32 %v4377_v15, %v3304_v16  ;;  %v4008_v3 = vld [vmem:[#allocation5 + $0x7b0] sm:$0xf0] }
  0xb5   :  { %v3035_v36 = vor.u32 %v4309_v19, %v3032_v22  ;;  %v4553_v2 = vld [vmem:[#allocation5 + $0x7a4] sm:$0xf]  ;;  %v3992_v22 = vld [vmem:[#allocation5 + $0x790] sm:$0xf0] }
  0xb6   :  { %v4011_v16 = vor.u32 %v4553_v2, %v4008_v3  ;;  %v4517_v19 = vld [vmem:[#allocation5 + $0x684] sm:$0xf]  ;;  %v3688_v54 = vld [vmem:[#allocation5 + $0x530] sm:$0xf0] }
  0xb7   :  { %2007 = vmatpush.bf16.msrb.mxu0 %v3115_v27  ;;  %2020 = vmatpush.bf16.msrb.mxu1 %v3243_v28  ;;  %v4373_v27 = vld [vmem:[#allocation5 + $0x204] sm:$0xf]  ;;  %v3288_v28 = vld [vmem:[#allocation5 + $0x210] sm:$0xf0] }
  0xb8   :  { %2033 = vmatpush.bf16.msrb.mxu2 %v3371_v31  ;;  %2046 = vmatpush.bf16.msrb.mxu3 %v3499_v32  ;;  %v4465_v31 = vld [vmem:[#allocation5 + $0x4e4] sm:$0xf]  ;;  %v3656_v32 = vld [vmem:[#allocation5 + $0x4f0] sm:$0xf0]  ;;  %v3291_v41 = vor.u32 %v4373_v27, %v3288_v28 }
  0xb9   :  { %v4533_v11 = vld [vmem:[#allocation5 + $0x704] sm:$0xf]  ;;  %v3928_v12 = vld [vmem:[#allocation5 + $0x710] sm:$0xf0] }
  0xbb   :  { %2008 = vmatpush.bf16.msrb.mxu0 %v3099_v39  ;;  %2021 = vmatpush.bf16.msrb.mxu1 %v3227_v40  ;;  %v4561_v39 = vld [vmem:[#allocation5 + $0x7e4] sm:$0xf]  ;;  %v4040_v40 = vld [vmem:[#allocation5 + $0x7f0] sm:$0xf0] }
  0xbc   :  { %2034 = vmatpush.bf16.msrb.mxu2 %v3355_v43  ;;  %2047 = vmatpush.bf16.msrb.mxu3 %v3483_v44  ;;  %v3659_v43 = vor.u32 %v4465_v31, %v3656_v32  ;;  %v3787_v44 = vor.u32 %v4497_v33, %v3784_v34  ;;  %v4043_v48 = vor.u32 %v4561_v39, %v4040_v40  ;;  %v4513_v31 = vld [vmem:[#allocation5 + $0x664] sm:$0xf]  ;;  %v3848_v32 = vld [vmem:[#allocation5 + $0x670] sm:$0xf0] }
  0xbd   :  { %v4545_v33 = vld [vmem:[#allocation5 + $0x764] sm:$0xf]  ;;  %v3976_v34 = vld [vmem:[#allocation5 + $0x770] sm:$0xf0]  ;;  %v3851_v39 = vor.u32 %v4513_v31, %v3848_v32 }
  0xbe   :  { %v3979_v40 = vor.u32 %v4545_v33, %v3976_v34  ;;  %v3262_v33 = vld [vmem:[#allocation5 + $0x1c8] sm:$0xf]  ;;  %v4368_v34 = vld [vmem:[#allocation5 + $0x1d4] sm:$0xf0] }
  0xbf   :  { %2009 = vmatpush.bf16.msrb.mxu0 %v3083_v51  ;;  %2022 = vmatpush.bf16.msrb.mxu1 %v3211_v52  ;;  %v4525_v51 = vld [vmem:[#allocation5 + $0x6c4] sm:$0xf]  ;;  %v3896_v52 = vld [vmem:[#allocation5 + $0x6d0] sm:$0xf0] }
  0xc0   :  { %2035 = vmatpush.bf16.msrb.mxu2 %v3339_v55  ;;  %2048 = vmatpush.bf16.msrb.mxu3 %v3467_v56  ;;  %v3643_v55 = vor.u32 %v4461_v45, %v3640_v46  ;;  %v3771_v56 = vor.u32 %v4493_v49, %v3768_v50  ;;  %v3899_v59 = vor.u32 %v4525_v51, %v3896_v52  ;;  %v4541_v45 = vld [vmem:[#allocation5 + $0x744] sm:$0xf]  ;;  %v3960_v46 = vld [vmem:[#allocation5 + $0x750] sm:$0xf0] }
  0xc1   :  { %v4441_v49 = vld [vmem:[#allocation5 + $0x424] sm:$0xf]  ;;  %v3560_v50 = vld [vmem:[#allocation5 + $0x430] sm:$0xf0]  ;;  %v3963_v52 = vor.u32 %v4541_v45, %v3960_v46  ;;  %v3246_v45 = vld [vmem:[#allocation5 + $0x1a8] sm:$0xf] }
  0xc2   :  { %v4364_v46 = vld [vmem:[#allocation5 + $0x1b4] sm:$0xf0] }
  0xc3   :  { %2010 = vmatpush.bf16.msrb.mxu0 %v3067_v63  ;;  %2023 = vmatpush.bf16.msrb.mxu1 %v3195_v1  ;;  %v4521_v63 = vld [vmem:[#allocation5 + $0x6a4] sm:$0xf]  ;;  %v3880_v1 = vld [vmem:[#allocation5 + $0x6b0] sm:$0xf0] }
  0xc4   :  { %2036 = vmatpush.bf16.msrb.mxu2 %v3323_v7  ;;  %2049 = vmatpush.bf16.msrb.mxu3 %v3451_v10  ;;  %v3627_v7 = vor.u32 %v4457_v57, %v3624_v58  ;;  %v3755_v10 = vor.u32 %v4489_v61, %v3752_v62  ;;  %v3883_v15 = vor.u32 %v4521_v63, %v3880_v1  ;;  %v4537_v57 = vld [vmem:[#allocation5 + $0x724] sm:$0xf]  ;;  %v3944_v58 = vld [vmem:[#allocation5 + $0x730] sm:$0xf0] }
  0xc5   :  { %v3691_v61 = vor.u32 %v4473_v53, %v3688_v54  ;;  %v3544_v62 = vld [vmem:[#allocation5 + $0x410] sm:$0xf0]  ;;  %v4469_v63 = vld [vmem:[#allocation5 + $0x504] sm:$0xf]  ;;  %v3947_v3 = vor.u32 %v4537_v57, %v3944_v58  ;;  %v3102_v53 = vld [vmem:[#allocation5 + $0x88] sm:$0xf] }
  0xc6   :  { %v3672_v1 = vld [vmem:[#allocation5 + $0x510] sm:$0xf0]  ;;  %v4328_v54 = vld [vmem:[#allocation5 + $0x94] sm:$0xf0]  ;;  %v3230_v57 = vld [vmem:[#allocation5 + $0x188] sm:$0xf] }
  0xc7   :  { %2011 = vmatpush.bf16.msrb.mxu0 %v3051_v20  ;;  %2024 = vmatpush.bf16.msrb.mxu1 %v3179_v21  ;;  %v3864_v20 = vld [vmem:[#allocation5 + $0x690] sm:$0xf0]  ;;  %v4549_v21 = vld [vmem:[#allocation5 + $0x784] sm:$0xf]  ;;  %v4360_v58 = vld [vmem:[#allocation5 + $0x194] sm:$0xf0] }
  0xc8   :  { %2037 = vmatpush.bf16.msrb.mxu2 %v3307_v25  ;;  %2050 = vmatpush.bf16.msrb.mxu3 %v3435_v26  ;;  %v4449_v25 = vld [vmem:[#allocation5 + $0x464] sm:$0xf]  ;;  %v3592_v26 = vld [vmem:[#allocation5 + $0x470] sm:$0xf0]  ;;  %v3867_v27 = vor.u32 %v4517_v19, %v3864_v20  ;;  %v3995_v28 = vor.u32 %v4549_v21, %v3992_v22  ;;  %v3406_v19 = vld [vmem:[#allocation5 + $0x2e8] sm:$0xf]  ;;  %v3675_v21 = vor.u32 %v4469_v63, %v3672_v1 }
  0xc9   :  { %v3595_v35 = vor.u32 %v4449_v25, %v3592_v26  ;;  %v4404_v22 = vld [vmem:[#allocation5 + $0x2f4] sm:$0xf0]  ;;  %v3931_v26 = vor.u32 %v4533_v11, %v3928_v12  ;;  %v3103_v63 = vor.u32 %v4328_v54, %v3102_v53  ;;  %v3231_v1 = vor.u32 %v4360_v58, %v3230_v57  ;;  %v3214_v11 = vld [vmem:[#allocation5 + $0x168] sm:$0xf] }
  0xca   :  { %v3407_v31 = vor.u32 %v4404_v22, %v3406_v19  ;;  %v4356_v12 = vld [vmem:[#allocation5 + $0x174] sm:$0xf0]  ;;  %v3422_v53 = vld [vmem:[#allocation5 + $0x308] sm:$0xf] }
  0xcb   :  { %2012 = vmatpush.bf16.msrb.mxu0 %v3035_v36  ;;  %2025 = vmatpush.bf16.msrb.mxu1 %v3163_v37  ;;  %v3723_v36 = vor.u32 %v4481_v29, %v3720_v30  ;;  %v4445_v37 = vld [vmem:[#allocation5 + $0x444] sm:$0xf]  ;;  %v3134_v29 = vld [vmem:[#allocation5 + $0xc8] sm:$0xf]  ;;  %v4336_v30 = vld [vmem:[#allocation5 + $0xd4] sm:$0xf0] }
  0xcc   :  { %2038 = vmatpush.bf16.msrb.mxu2 %v3291_v41  ;;  %2051 = vmatpush.bf16.msrb.mxu3 %v3419_v42  ;;  %v4477_v41 = vld [vmem:[#allocation5 + $0x544] sm:$0xf]  ;;  %v3704_v42 = vld [vmem:[#allocation5 + $0x550] sm:$0xf0]  ;;  %v4320_v22 = vld [vmem:[#allocation5 + $0x54] sm:$0xf0] }
  0xcd   :  { %v4408_v54 = vld [vmem:[#allocation5 + $0x314] sm:$0xf0]  ;;  %v3790_v57 = vld [vmem:[#allocation5 + $0x5e8] sm:$0xf] }
  0xce   :  { %2013 = vmatmul.bf16.vlgmr.msrb.gmra.mxu0 %v4857_v0  ;;  %2026 = vmatmul.bf16.vlgmr.msrb.gmra.mxu1 %v4859_v4  ;;  %v4500_v58 = vld [vmem:[#allocation5 + $0x5f4] sm:$0xf0] }
  0xcf   :  { %2057 = vmatpush.bf16.msra.mxu0 %v3659_v43  ;;  %2070 = vmatpush.bf16.msra.mxu1 %v3787_v44  ;;  %v4509_v43 = vld [vmem:[#allocation5 + $0x644] sm:$0xf]  ;;  %v3832_v44 = vld [vmem:[#allocation5 + $0x650] sm:$0xf0] }
  0xd0   :  { %2083 = vmatpush.bf16.msra.mxu2 %v3915_v47  ;;  %2096 = vmatpush.bf16.msra.mxu3 %v4043_v48  ;;  %v3579_v47 = vor.u32 %v4445_v37, %v3576_v38  ;;  %v3707_v48 = vor.u32 %v4477_v41, %v3704_v42  ;;  %v3835_v51 = vor.u32 %v4509_v43, %v3832_v44  ;;  %v3518_v37 = vld [vmem:[#allocation5 + $0x3c8] sm:$0xf]  ;;  %v4432_v38 = vld [vmem:[#allocation5 + $0x3d4] sm:$0xf0] }
  0xd1   :  { %2039 = vmatmul.bf16.vlgmr.msrb.gmra.mxu2 %v4861_v5  ;;  %2052 = vmatmul.bf16.vlgmr.msrb.gmra.mxu3 %v4863_v6  ;;  %v3118_v41 = vld [vmem:[#allocation5 + $0xa8] sm:$0xf]  ;;  %v4332_v42 = vld [vmem:[#allocation5 + $0xb4] sm:$0xf0]  ;;  %v3519_v44 = vor.u32 %v4432_v38, %v3518_v37 }
  0xd2   :  { %v3182_v37 = vld [vmem:[#allocation5 + $0x128] sm:$0xf]  ;;  %v4348_v38 = vld [vmem:[#allocation5 + $0x134] sm:$0xf0] }
  0xd3   :  { %2058 = vmatpush.bf16.msra.mxu0 %v3643_v55  ;;  %2071 = vmatpush.bf16.msra.mxu1 %v3771_v56  ;;  %v4505_v55 = vld [vmem:[#allocation5 + $0x624] sm:$0xf]  ;;  %v3816_v56 = vld [vmem:[#allocation5 + $0x630] sm:$0xf0] }
  0xd4   :  { %2084 = vmatpush.bf16.msra.mxu2 %v3899_v59  ;;  %2097 = vmatpush.bf16.msra.mxu3 %v4027_v60  ;;  %v4437_v59 = vld [vmem:[#allocation5 + $0x404] sm:$0xf]  ;;  %v3563_v60 = vor.u32 %v4441_v49, %v3560_v50  ;;  %v3819_v2 = vor.u32 %v4505_v55, %v3816_v56  ;;  %v3502_v49 = vld [vmem:[#allocation5 + $0x3a8] sm:$0xf]  ;;  %v4428_v50 = vld [vmem:[#allocation5 + $0x3b4] sm:$0xf0] }
  0xd5   :  { %v3547_v20 = vor.u32 %v4437_v59, %v3544_v62  ;;  %v3503_v56 = vor.u32 %v4428_v50, %v3502_v49  ;;  %v3358_v59 = vld [vmem:[#allocation5 + $0x288] sm:$0xf]  ;;  %v4424_v62 = vld [vmem:[#allocation5 + $0x394] sm:$0xf0] }
  0xd7   :  { %2059 = vmatpush.bf16.msra.mxu0 %v3627_v7  ;;  %2072 = vmatpush.bf16.msra.mxu1 %v3755_v10  ;;  %v4501_v7 = vld [vmem:[#allocation5 + $0x604] sm:$0xf]  ;;  %v3800_v10 = vld [vmem:[#allocation5 + $0x610] sm:$0xf0] }
  0xd8   :  { %2085 = vmatpush.bf16.msra.mxu2 %v3883_v15  ;;  %2098 = vmatpush.bf16.msra.mxu3 %v4011_v16  ;;  %v3150_v15 = vld [vmem:[#allocation5 + $0xe8] sm:$0xf]  ;;  %v4340_v16 = vld [vmem:[#allocation5 + $0xf4] sm:$0xf0]  ;;  %v3803_v25 = vor.u32 %v4501_v7, %v3800_v10 }
  0xdb   :  { %2060 = vmatpush.bf16.msra.mxu0 %v3611_v23  ;;  %2073 = vmatpush.bf16.msra.mxu1 %v3739_v24  ;;  %v3534_v23 = vld [vmem:[#allocation5 + $0x3e8] sm:$0xf]  ;;  %v4436_v24 = vld [vmem:[#allocation5 + $0x3f4] sm:$0xf0] }
  0xdc   :  { %2086 = vmatpush.bf16.msra.mxu2 %v3867_v27  ;;  %2099 = vmatpush.bf16.msra.mxu3 %v3995_v28  ;;  %v3151_v27 = vor.u32 %v4340_v16, %v3150_v15  ;;  %v3279_v28 = vor.u32 %v4372_v18, %v3278_v17  ;;  %v3535_v32 = vor.u32 %v4436_v24, %v3534_v23  ;;  %v3342_v15 = vld [vmem:[#allocation5 + $0x268] sm:$0xf]  ;;  %v4388_v16 = vld [vmem:[#allocation5 + $0x274] sm:$0xf0] }
  0xdd   :  { %v3470_v17 = vld [vmem:[#allocation5 + $0x368] sm:$0xf]  ;;  %v4420_v18 = vld [vmem:[#allocation5 + $0x374] sm:$0xf0]  ;;  %v3343_v23 = vor.u32 %v4388_v16, %v3342_v15 }
  0xde   :  { %v3471_v24 = vor.u32 %v4420_v18, %v3470_v17  ;;  %v3774_v17 = vld [vmem:[#allocation5 + $0x5c8] sm:$0xf]  ;;  %v4496_v18 = vld [vmem:[#allocation5 + $0x5d4] sm:$0xf0] }
  0xdf   :  { %2061 = vmatpush.bf16.msra.mxu0 %v3595_v35  ;;  %2074 = vmatpush.bf16.msra.mxu1 %v3723_v36  ;;  %v3390_v35 = vld [vmem:[#allocation5 + $0x2c8] sm:$0xf]  ;;  %v4400_v36 = vld [vmem:[#allocation5 + $0x2d4] sm:$0xf0] }
  0xe0   :  { %2087 = vmatpush.bf16.msra.mxu2 %v3851_v39  ;;  %2100 = vmatpush.bf16.msra.mxu3 %v3979_v40  ;;  %v3135_v39 = vor.u32 %v4336_v30, %v3134_v29  ;;  %v3263_v40 = vor.u32 %v4368_v34, %v3262_v33  ;;  %v3391_v43 = vor.u32 %v4400_v36, %v3390_v35  ;;  %v3454_v29 = vld [vmem:[#allocation5 + $0x348] sm:$0xf]  ;;  %v4416_v30 = vld [vmem:[#allocation5 + $0x354] sm:$0xf0] }
  0xe1   :  { %v3054_v33 = vld [vmem:[#allocation5 + $0x28] sm:$0xf]  ;;  %v4316_v34 = vld [vmem:[#allocation5 + $0x34] sm:$0xf0]  ;;  %v3455_v36 = vor.u32 %v4416_v30, %v3454_v29 }
  0xe2   :  { %v3758_v29 = vld [vmem:[#allocation5 + $0x5a8] sm:$0xf]  ;;  %v4492_v30 = vld [vmem:[#allocation5 + $0x5b4] sm:$0xf0] }
  0xe3   :  { %2062 = vmatpush.bf16.msra.mxu0 %v3579_v47  ;;  %2075 = vmatpush.bf16.msra.mxu1 %v3707_v48  ;;  %v3374_v47 = vld [vmem:[#allocation5 + $0x2a8] sm:$0xf]  ;;  %v4396_v48 = vld [vmem:[#allocation5 + $0x2b4] sm:$0xf0] }
  0xe4   :  { %2088 = vmatpush.bf16.msra.mxu2 %v3835_v51  ;;  %2101 = vmatpush.bf16.msra.mxu3 %v3963_v52  ;;  %v3119_v51 = vor.u32 %v4332_v42, %v3118_v41  ;;  %v3247_v52 = vor.u32 %v4364_v46, %v3246_v45  ;;  %v3375_v55 = vor.u32 %v4396_v48, %v3374_v47  ;;  %v3438_v41 = vld [vmem:[#allocation5 + $0x328] sm:$0xf]  ;;  %v4412_v42 = vld [vmem:[#allocation5 + $0x334] sm:$0xf0] }
  0xe5   :  { %v3183_v45 = vor.u32 %v4348_v38, %v3182_v37  ;;  %v4312_v46 = vld [vmem:[#allocation5 + $0x14] sm:$0xf0]  ;;  %v3166_v47 = vld [vmem:[#allocation5 + $0x108] sm:$0xf]  ;;  %v3439_v50 = vor.u32 %v4412_v42, %v3438_v41  ;;  %v3759_v38 = vor.u32 %v4492_v30, %v3758_v29 }
  0xe6   :  { %v4344_v48 = vld [vmem:[#allocation5 + $0x114] sm:$0xf0]  ;;  %v3822_v29 = vld [vmem:[#allocation5 + $0x628] sm:$0xf] }
  0xe7   :  { %2063 = vmatpush.bf16.msra.mxu0 %v3563_v60  ;;  %2076 = vmatpush.bf16.msra.mxu1 %v3691_v61  ;;  %v4392_v60 = vld [vmem:[#allocation5 + $0x294] sm:$0xf0]  ;;  %v3486_v61 = vld [vmem:[#allocation5 + $0x388] sm:$0xf] }
  0xe8   :  { %2089 = vmatpush.bf16.msra.mxu2 %v3819_v2  ;;  %2102 = vmatpush.bf16.msra.mxu3 %v3947_v3  ;;  %v3086_v2 = vld [vmem:[#allocation5 + $0x68] sm:$0xf]  ;;  %v4324_v3 = vld [vmem:[#allocation5 + $0x74] sm:$0xf0]  ;;  %v3359_v7 = vor.u32 %v4392_v60, %v3358_v59  ;;  %v3487_v10 = vor.u32 %v4424_v62, %v3486_v61  ;;  %v3167_v61 = vor.u32 %v4344_v48, %v3166_v47 }
  0xe9   :  { %v3087_v19 = vor.u32 %v4324_v3, %v3086_v2  ;;  %v3918_v59 = vld [vmem:[#allocation5 + $0x6e8] sm:$0xf]  ;;  %v4532_v62 = vld [vmem:[#allocation5 + $0x6f4] sm:$0xf0]  ;;  %v3423_v3 = vor.u32 %v4408_v54, %v3422_v53 }
  0xea   :  { %v3919_v15 = vor.u32 %v4532_v62, %v3918_v59  ;;  %v3998_v47 = vld [vmem:[#allocation5 + $0x788] sm:$0xf]  ;;  %v4552_v48 = vld [vmem:[#allocation5 + $0x794] sm:$0xf0] }
  0xeb   :  { %2064 = vmatpush.bf16.msra.mxu0 %v3547_v20  ;;  %2077 = vmatpush.bf16.msra.mxu1 %v3675_v21  ;;  %v3215_v20 = vor.u32 %v4356_v12, %v3214_v11  ;;  %v3070_v21 = vld [vmem:[#allocation5 + $0x48] sm:$0xf]  ;;  %v4464_v12 = vld [vmem:[#allocation5 + $0x4d4] sm:$0xf0]  ;;  %v3999_v54 = vor.u32 %v4552_v48, %v3998_v47 }
  0xec   :  { %2090 = vmatpush.bf16.msra.mxu2 %v3803_v25  ;;  %2103 = vmatpush.bf16.msra.mxu3 %v3931_v26  ;;  %v3198_v25 = vld [vmem:[#allocation5 + $0x148] sm:$0xf]  ;;  %v4352_v26 = vld [vmem:[#allocation5 + $0x154] sm:$0xf0] }
  0xed   :  { %v3646_v11 = vld [vmem:[#allocation5 + $0x4c8] sm:$0xf]  ;;  %v4548_v62 = vld [vmem:[#allocation5 + $0x774] sm:$0xf0] }
  0xee   :  { %2065 = vmatmul.bf16.vlgmr.msra.gmra.mxu0 %v4869_v8  ;;  %2078 = vmatmul.bf16.vlgmr.msra.gmra.mxu1 %v4873_v13  ;;  %v3806_v48 = vld [vmem:[#allocation5 + $0x608] sm:$0xf] }
  0xef   :  { %2109 = vmatpush.bf16.msrb.mxu0 %v3151_v27  ;;  %2122 = vmatpush.bf16.msrb.mxu1 %v3279_v28  ;;  %v3326_v27 = vld [vmem:[#allocation5 + $0x248] sm:$0xf]  ;;  %v4384_v28 = vld [vmem:[#allocation5 + $0x254] sm:$0xf0] }
  0xf0   :  { %2135 = vmatpush.bf16.msrb.mxu2 %v3407_v31  ;;  %2148 = vmatpush.bf16.msrb.mxu3 %v3535_v32  ;;  %v3071_v31 = vor.u32 %v4320_v22, %v3070_v21  ;;  %v3199_v32 = vor.u32 %v4352_v26, %v3198_v25  ;;  %v3327_v35 = vor.u32 %v4384_v28, %v3326_v27  ;;  %v4030_v21 = vld [vmem:[#allocation5 + $0x7c8] sm:$0xf]  ;;  %v4560_v22 = vld [vmem:[#allocation5 + $0x7d4] sm:$0xf0] }
  0xf1   :  { %2091 = vmatmul.bf16.vlgmr.msra.gmra.mxu2 %v4871_v9  ;;  %2104 = vmatmul.bf16.vlgmr.msra.gmra.mxu3 %v4875_v14  ;;  %v3630_v25 = vld [vmem:[#allocation5 + $0x4a8] sm:$0xf]  ;;  %v4460_v26 = vld [vmem:[#allocation5 + $0x4b4] sm:$0xf0]  ;;  %v4031_v28 = vor.u32 %v4560_v22, %v4030_v21 }
  0xf2   :  { %v3631_v37 = vor.u32 %v4460_v26, %v3630_v25 }
  0xf3   :  { %2110 = vmatpush.bf16.msrb.mxu0 %v3135_v39  ;;  %2123 = vmatpush.bf16.msrb.mxu1 %v3263_v40  ;;  %v3310_v39 = vld [vmem:[#allocation5 + $0x228] sm:$0xf]  ;;  %v4380_v40 = vld [vmem:[#allocation5 + $0x234] sm:$0xf0] }
  0xf4   :  { %2136 = vmatpush.bf16.msrb.mxu2 %v3391_v43  ;;  %2149 = vmatpush.bf16.msrb.mxu3 %v3519_v44  ;;  %v3038_v43 = vld [vmem:[#allocation5 + $0x8] sm:$0xf]  ;;  %v3055_v44 = vor.u32 %v4316_v34, %v3054_v33  ;;  %v3311_v49 = vor.u32 %v4380_v40, %v3310_v39  ;;  %v4556_v34 = vld [vmem:[#allocation5 + $0x7b4] sm:$0xf0] }
  0xf5   :  { %v3039_v60 = vor.u32 %v4312_v46, %v3038_v43  ;;  %v4014_v33 = vld [vmem:[#allocation5 + $0x7a8] sm:$0xf]  ;;  %v4456_v40 = vld [vmem:[#allocation5 + $0x494] sm:$0xf0] }
  0xf6   :  { %v3614_v39 = vld [vmem:[#allocation5 + $0x488] sm:$0xf]  ;;  %v4015_v42 = vor.u32 %v4556_v34, %v4014_v33  ;;  %v4520_v46 = vld [vmem:[#allocation5 + $0x694] sm:$0xf0] }
  0xf7   :  { %2111 = vmatpush.bf16.msrb.mxu0 %v3119_v51  ;;  %2124 = vmatpush.bf16.msrb.mxu1 %v3247_v52  ;;  %v3294_v51 = vld [vmem:[#allocation5 + $0x208] sm:$0xf]  ;;  %v4376_v52 = vld [vmem:[#allocation5 + $0x214] sm:$0xf0] }
  0xf8   :  { %2137 = vmatpush.bf16.msrb.mxu2 %v3375_v55  ;;  %2150 = vmatpush.bf16.msrb.mxu3 %v3503_v56  ;;  %v3662_v55 = vld [vmem:[#allocation5 + $0x4e8] sm:$0xf]  ;;  %v4468_v56 = vld [vmem:[#allocation5 + $0x4f4] sm:$0xf0]  ;;  %v3295_v2 = vor.u32 %v4376_v52, %v3294_v51 }
  0xf9   :  { %v3742_v43 = vld [vmem:[#allocation5 + $0x588] sm:$0xf]  ;;  %v4452_v52 = vld [vmem:[#allocation5 + $0x474] sm:$0xf0] }
  0xfa   :  { %v3598_v51 = vld [vmem:[#allocation5 + $0x468] sm:$0xf]  ;;  %v4540_v34 = vld [vmem:[#allocation5 + $0x734] sm:$0xf0] }
  0xfb   :  { %2112 = vmatpush.bf16.msrb.mxu0 %v3103_v63  ;;  %2125 = vmatpush.bf16.msrb.mxu1 %v3231_v1  ;;  %v4046_v63 = vld [vmem:[#allocation5 + $0x7e8] sm:$0xf]  ;;  %v4564_v1 = vld [vmem:[#allocation5 + $0x7f4] sm:$0xf0] }
  0xfc   :  { %2138 = vmatpush.bf16.msrb.mxu2 %v3359_v7  ;;  %2151 = vmatpush.bf16.msrb.mxu3 %v3487_v10  ;;  %v3663_v7 = vor.u32 %v4468_v56, %v3662_v55  ;;  %v3791_v10 = vor.u32 %v4500_v58, %v3790_v57  ;;  %v4047_v16 = vor.u32 %v4564_v1, %v4046_v63  ;;  %v3726_v55 = vld [vmem:[#allocation5 + $0x568] sm:$0xf]  ;;  %v4484_v56 = vld [vmem:[#allocation5 + $0x574] sm:$0xf0] }
  0xfd   :  { %v3854_v57 = vld [vmem:[#allocation5 + $0x668] sm:$0xf] }
  0xfe   :  { %v3950_v33 = vld [vmem:[#allocation5 + $0x728] sm:$0xf] }
  0xff   :  { %2113 = vmatpush.bf16.msrb.mxu0 %v3087_v19  ;;  %2126 = vmatpush.bf16.msrb.mxu1 %v3215_v20  ;;  %v3902_v19 = vld [vmem:[#allocation5 + $0x6c8] sm:$0xf]  ;;  %v4528_v20 = vld [vmem:[#allocation5 + $0x6d4] sm:$0xf0]  ;;  %v3951_v47 = vor.u32 %v4540_v34, %v3950_v33  ;;  %v4362_v34 = vld [vmem:[#allocation5 + $0x1ac] sm:$0xf] }
 0x100   :  { %2139 = vmatpush.bf16.msrb.mxu2 %v3343_v23  ;;  %2152 = vmatpush.bf16.msrb.mxu3 %v3471_v24  ;;  %v3647_v23 = vor.u32 %v4464_v12, %v3646_v11  ;;  %v3775_v24 = vor.u32 %v4496_v18, %v3774_v17  ;;  %v3903_v27 = vor.u32 %v4528_v20, %v3902_v19  ;;  %v3838_v17 = vld [vmem:[#allocation5 + $0x648] sm:$0xf]  ;;  %v4512_v18 = vld [vmem:[#allocation5 + $0x654] sm:$0xf0] }
 0x101   :  { %v3966_v19 = vld [vmem:[#allocation5 + $0x748] sm:$0xf]  ;;  %v4544_v20 = vld [vmem:[#allocation5 + $0x754] sm:$0xf0]  ;;  %v3839_v25 = vor.u32 %v4512_v18, %v3838_v17 }
 0x102   :  { %v3967_v26 = vor.u32 %v4544_v20, %v3966_v19  ;;  %v4366_v20 = vld [vmem:[#allocation5 + $0x1cc] sm:$0xf] }
 0x103   :  { %2114 = vmatpush.bf16.msrb.mxu0 %v3071_v31  ;;  %2127 = vmatpush.bf16.msrb.mxu1 %v3199_v32  ;;  %v3886_v31 = vld [vmem:[#allocation5 + $0x6a8] sm:$0xf]  ;;  %v4524_v32 = vld [vmem:[#allocation5 + $0x6b4] sm:$0xf0] }
 0x104   :  { %2140 = vmatpush.bf16.msrb.mxu2 %v3327_v35  ;;  %2153 = vmatpush.bf16.msrb.mxu3 %v3455_v36  ;;  %v3887_v41 = vor.u32 %v4524_v32, %v3886_v31  ;;  %v4508_v32 = vld [vmem:[#allocation5 + $0x634] sm:$0xf0] }
 0x107   :  { %2115 = vmatpush.bf16.msrb.mxu0 %v3055_v44  ;;  %2128 = vmatpush.bf16.msrb.mxu1 %v3183_v45  ;;  %v4488_v44 = vld [vmem:[#allocation5 + $0x594] sm:$0xf0]  ;;  %v3870_v45 = vld [vmem:[#allocation5 + $0x688] sm:$0xf] }
 0x108   :  { %2141 = vmatpush.bf16.msrb.mxu2 %v3311_v49  ;;  %2154 = vmatpush.bf16.msrb.mxu3 %v3439_v50  ;;  %v3615_v49 = vor.u32 %v4456_v40, %v3614_v39  ;;  %v3743_v50 = vor.u32 %v4488_v44, %v3742_v43  ;;  %v3871_v53 = vor.u32 %v4520_v46, %v3870_v45  ;;  %v3550_v39 = vld [vmem:[#allocation5 + $0x408] sm:$0xf]  ;;  %v4440_v43 = vld [vmem:[#allocation5 + $0x414] sm:$0xf0] }
 0x109   :  { %v3678_v44 = vld [vmem:[#allocation5 + $0x508] sm:$0xf]  ;;  %v4472_v45 = vld [vmem:[#allocation5 + $0x514] sm:$0xf0]  ;;  %v3823_v46 = vor.u32 %v4508_v32, %v3822_v29 }
 0x10a   :  { %v4893_v35 = vpop.f32.mrf.mxu0  ;;  %v4895_v36 = vpop.f32.mrf.mxu1 }
 0x10b   :  { %2116 = vmatpush.bf16.msrb.mxu0 %v3039_v60  ;;  %2129 = vmatpush.bf16.msrb.mxu1 %v3167_v61  ;;  %v4516_v60 = vld [vmem:[#allocation5 + $0x674] sm:$0xf0]  ;;  %v3982_v61 = vld [vmem:[#allocation5 + $0x768] sm:$0xf] }
 0x10c   :  { %2142 = vmatpush.bf16.msrb.mxu2 %v3295_v2  ;;  %2155 = vmatpush.bf16.msrb.mxu3 %v3423_v3  ;;  %v3599_v2 = vor.u32 %v4452_v52, %v3598_v51  ;;  %v3727_v3 = vor.u32 %v4484_v56, %v3726_v55  ;;  %v3855_v11 = vor.u32 %v4516_v60, %v3854_v57  ;;  %v4536_v52 = vld [vmem:[#allocation5 + $0x714] sm:$0xf0]  ;;  %v4370_v55 = vld [vmem:[#allocation5 + $0x1ec] sm:$0xf]  ;;  %v3280_v56 = vld [vmem:[#allocation5 + $0x1f8] sm:$0xf0] }
 0x10d   :  { %v3983_v12 = vor.u32 %v4548_v62, %v3982_v61  ;;  %v4402_v57 = vld [vmem:[#allocation5 + $0x2ec] sm:$0xf]  ;;  %v3679_v60 = vor.u32 %v4472_v45, %v3678_v44  ;;  %v3408_v61 = vld [vmem:[#allocation5 + $0x2f8] sm:$0xf0] }
 0x10e   :  { %2117 = vmatmul.bf16.vlgmr.msrb.gmra.mxu0 %v4857_v0  ;;  %2130 = vmatmul.bf16.vlgmr.msrb.gmra.mxu1 %v4859_v4  ;;  %v4434_v62 = vld [vmem:[#allocation5 + $0x3ec] sm:$0xf] }
 0x10f   :  { %2161 = vmatpush.bf16.msra.mxu0 %v3663_v7  ;;  %2174 = vmatpush.bf16.msra.mxu1 %v3791_v10  ;;  %v3582_v7 = vld [vmem:[#allocation5 + $0x448] sm:$0xf]  ;;  %v4448_v10 = vld [vmem:[#allocation5 + $0x454] sm:$0xf0] }
 0x110   :  { %2187 = vmatpush.bf16.msra.mxu2 %v3919_v15  ;;  %2200 = vmatpush.bf16.msra.mxu3 %v4047_v16  ;;  %v3710_v15 = vld [vmem:[#allocation5 + $0x548] sm:$0xf]  ;;  %v4480_v16 = vld [vmem:[#allocation5 + $0x554] sm:$0xf0]  ;;  %v3583_v21 = vor.u32 %v4448_v10, %v3582_v7  ;;  %v3283_v7 = vor.u32 %v4370_v55, %v3280_v56  ;;  %v3488_v55 = vld [vmem:[#allocation5 + $0x398] sm:$0xf0] }
 0x111   :  { %2143 = vmatmul.bf16.vlgmr.msrb.gmra.mxu2 %v4861_v5  ;;  %2156 = vmatmul.bf16.vlgmr.msrb.gmra.mxu3 %v4863_v6  ;;  %v4897_v58 = vpop.f32.mrf.mxu2  ;;  %v4899_v59 = vpop.f32.mrf.mxu3  ;;  %v3711_v22 = vor.u32 %v4480_v16, %v3710_v15  ;;  %v3136_v15 = vld [vmem:[#allocation5 + $0xd8] sm:$0xf0]  ;;  %v3411_v16 = vor.u32 %v4402_v57, %v3408_v61 }
 0x112   :  { %v580_v63 = vpop.f32.mrf.mxu0  ;;  %v593_v1 = vpop.f32.mrf.mxu1 }
 0x113   :  { %2162 = vmatpush.bf16.msra.mxu0 %v3647_v23  ;;  %2175 = vmatpush.bf16.msra.mxu1 %v3775_v24  ;;  %v3566_v23 = vld [vmem:[#allocation5 + $0x428] sm:$0xf]  ;;  %v4444_v24 = vld [vmem:[#allocation5 + $0x434] sm:$0xf0]  ;;  %v3536_v63 = vld [vmem:[#allocation5 + $0x3f8] sm:$0xf0] }
 0x114   :  { %2188 = vmatpush.bf16.msra.mxu2 %v3903_v27  ;;  %2201 = vmatpush.bf16.msra.mxu3 %v4031_v28  ;;  %v3694_v27 = vld [vmem:[#allocation5 + $0x528] sm:$0xf]  ;;  %v4476_v28 = vld [vmem:[#allocation5 + $0x534] sm:$0xf0]  ;;  %v3567_v40 = vor.u32 %v4444_v24, %v3566_v23  ;;  %v3539_v17 = vor.u32 %v4434_v62, %v3536_v63  ;;  %v3392_v24 = vld [vmem:[#allocation5 + $0x2d8] sm:$0xf0] }
 0x115   :  { %v4322_v62 = vld [vmem:[#allocation5 + $0x6c] sm:$0xf]  ;;  %v3088_v63 = vld [vmem:[#allocation5 + $0x78] sm:$0xf0] }
 0x117   :  { %2163 = vmatpush.bf16.msra.mxu0 %v3631_v37  ;;  %2176 = vmatpush.bf16.msra.mxu1 %v3759_v38 }
 0x118   :  { %2189 = vmatpush.bf16.msra.mxu2 %v3887_v41  ;;  %2202 = vmatpush.bf16.msra.mxu3 %v4015_v42  ;;  %v3695_v41 = vor.u32 %v4476_v28, %v3694_v27 }
 0x119   :  { %v606_v30 = vpop.f32.mrf.mxu2  ;;  %v619_v31 = vpop.f32.mrf.mxu3 }
 0x11a   :  { %v1910_v37 = vpop.f32.mrf.mxu0  ;;  %v1923_v38 = vpop.f32.mrf.mxu1  ;;  %v4330_v30 = vld [vmem:[#allocation5 + $0xac] sm:$0xf]  ;;  %v3120_v31 = vld [vmem:[#allocation5 + $0xb8] sm:$0xf0] }
 0x11b   :  { %2164 = vmatpush.bf16.msra.mxu0 %v3615_v49  ;;  %2177 = vmatpush.bf16.msra.mxu1 %v3743_v50  ;;  %v1911_v42 = vadd.f32 %v1910_v37, %v4893_v35  ;;  %v4504_v49 = vld [vmem:[#allocation5 + $0x614] sm:$0xf0]  ;;  %v3934_v50 = vld [vmem:[#allocation5 + $0x708] sm:$0xf]  ;;  %v3551_v35 = vor.u32 %v4440_v43, %v3550_v39  ;;  %v3248_v37 = vld [vmem:[#allocation5 + $0x1b8] sm:$0xf0] }
 0x11c   :  { %2190 = vmatpush.bf16.msra.mxu2 %v3871_v53  ;;  %2203 = vmatpush.bf16.msra.mxu3 %v3999_v54  ;;  %v4338_v53 = vld [vmem:[#allocation5 + $0xec] sm:$0xf]  ;;  %v3152_v54 = vld [vmem:[#allocation5 + $0xf8] sm:$0xf0]  ;;  %v3807_v1 = vor.u32 %v4504_v49, %v3806_v48  ;;  %v3251_v43 = vor.u32 %v4362_v34, %v3248_v37 }
 0x11d   :  { %v1924_v51 = vadd.f32 %v1923_v38, %v1911_v42  ;;  %v4394_v38 = vld [vmem:[#allocation5 + $0x2ac] sm:$0xf]  ;;  %v3376_v39 = vld [vmem:[#allocation5 + $0x2b8] sm:$0xf0]  ;;  %v3123_v42 = vor.u32 %v4330_v30, %v3120_v31 }
 0x11e   :  { %v3379_v48 = vor.u32 %v4394_v38, %v3376_v39  ;;  %v4414_v30 = vld [vmem:[#allocation5 + $0x34c] sm:$0xf]  ;;  %v3456_v31 = vld [vmem:[#allocation5 + $0x358] sm:$0xf0] }
 0x11f   :  { %2165 = vmatpush.bf16.msra.mxu0 %v3599_v2  ;;  %2178 = vmatpush.bf16.msra.mxu1 %v3727_v3  ;;  %v3935_v2 = vor.u32 %v4536_v52, %v3934_v50  ;;  %v3155_v3 = vor.u32 %v4338_v53, %v3152_v54  ;;  %v4358_v50 = vld [vmem:[#allocation5 + $0x18c] sm:$0xf]  ;;  %v3360_v53 = vld [vmem:[#allocation5 + $0x298] sm:$0xf0] }
 0x120   :  { %2191 = vmatpush.bf16.msra.mxu2 %v3855_v11  ;;  %2204 = vmatpush.bf16.msra.mxu3 %v3983_v12  ;;  %v4334_v12 = vld [vmem:[#allocation5 + $0xcc] sm:$0xf]  ;;  %v3056_v39 = vld [vmem:[#allocation5 + $0x38] sm:$0xf0] }
 0x121   :  { %v1936_v10 = vpop.f32.mrf.mxu2  ;;  %v1949_v11 = vpop.f32.mrf.mxu3  ;;  %v3139_v28 = vor.u32 %v4334_v12, %v3136_v15  ;;  %v4390_v52 = vld [vmem:[#allocation5 + $0x28c] sm:$0xf]  ;;  %v3344_v12 = vld [vmem:[#allocation5 + $0x278] sm:$0xf0] }
 0x122   :  { %v1937_v18 = vadd.f32 %v1936_v10, %v1924_v51  ;;  %v1912_v19 = vpop.f32.mrf.mxu0  ;;  %v1925_v23 = vpop.f32.mrf.mxu1  ;;  %v3232_v51 = vld [vmem:[#allocation5 + $0x198] sm:$0xf0]  ;;  %v4422_v54 = vld [vmem:[#allocation5 + $0x38c] sm:$0xf] }
 0x123   :  { %2166 = vmatpush.bf16.msra.mxu0 %v3583_v21  ;;  %2179 = vmatpush.bf16.msra.mxu1 %v3711_v22  ;;  %v3264_v21 = vld [vmem:[#allocation5 + $0x1d8] sm:$0xf0]  ;;  %v4398_v22 = vld [vmem:[#allocation5 + $0x2cc] sm:$0xf] }
 0x124   :  { %2192 = vmatpush.bf16.msra.mxu2 %v3839_v25  ;;  %2205 = vmatpush.bf16.msra.mxu3 %v3967_v26  ;;  %v4430_v25 = vld [vmem:[#allocation5 + $0x3cc] sm:$0xf]  ;;  %v3520_v26 = vld [vmem:[#allocation5 + $0x3d8] sm:$0xf0]  ;;  %v1950_v27 = vadd.f32 %v1949_v11, %v1937_v18  ;;  %v3267_v29 = vor.u32 %v4366_v20, %v3264_v21  ;;  %v3395_v32 = vor.u32 %v4398_v22, %v3392_v24 }
 0x125   :  { %v3523_v33 = vor.u32 %v4430_v25, %v3520_v26  ;;  %v4386_v10 = vld [vmem:[#allocation5 + $0x26c] sm:$0xf]  ;;  %v3072_v20 = vld [vmem:[#allocation5 + $0x58] sm:$0xf0] }
 0x126   :  { %v4418_v15 = vld [vmem:[#allocation5 + $0x36c] sm:$0xf]  ;;  %v3347_v21 = vor.u32 %v4386_v10, %v3344_v12  ;;  %v3200_v25 = vld [vmem:[#allocation5 + $0x158] sm:$0xf0] }
 0x127   :  { %2167 = vmatpush.bf16.msra.mxu0 %v3567_v40  ;;  %2180 = vmatpush.bf16.msra.mxu1 %v3695_v41  ;;  %v4426_v40 = vld [vmem:[#allocation5 + $0x3ac] sm:$0xf]  ;;  %v3504_v41 = vld [vmem:[#allocation5 + $0x3b8] sm:$0xf0] }
 0x128   :  { %2193 = vmatpush.bf16.msra.mxu2 %v3823_v46  ;;  %2206 = vmatpush.bf16.msra.mxu3 %v3951_v47  ;;  %v4326_v46 = vld [vmem:[#allocation5 + $0x8c] sm:$0xf]  ;;  %v3104_v47 = vld [vmem:[#allocation5 + $0x98] sm:$0xf0]  ;;  %v3507_v49 = vor.u32 %v4426_v40, %v3504_v41 }
 0x129   :  { %v1938_v44 = vpop.f32.mrf.mxu2  ;;  %v1951_v45 = vpop.f32.mrf.mxu3  ;;  %v4318_v19 = vld [vmem:[#allocation5 + $0x4c] sm:$0xf] }
 0x12a   :  { %v4350_v24 = vld [vmem:[#allocation5 + $0x14c] sm:$0xf]  ;;  %v3075_v34 = vor.u32 %v4318_v19, %v3072_v20  ;;  %v3184_v44 = vld [vmem:[#allocation5 + $0x138] sm:$0xf0] }
 0x12b   :  { %2168 = vmatpush.bf16.msra.mxu0 %v3551_v35  ;;  %2181 = vmatpush.bf16.msra.mxu1 %v3679_v60  ;;  %v1962_v56 = vpop.f32.mrf.mxu0  ;;  %v3107_v35 = vor.u32 %v4326_v46, %v3104_v47  ;;  %v3235_v60 = vor.u32 %v4358_v50, %v3232_v51  ;;  %v1975_v61 = vpop.f32.mrf.mxu1  ;;  %v4382_v26 = vld [vmem:[#allocation5 + $0x24c] sm:$0xf]  ;;  %v3203_v37 = vor.u32 %v4350_v24, %v3200_v25  ;;  %v3312_v46 = vld [vmem:[#allocation5 + $0x238] sm:$0xf0] }
 0x12c   :  { %2194 = vmatpush.bf16.msra.mxu2 %v3807_v1  ;;  %2207 = vmatpush.bf16.msra.mxu3 %v3935_v2  ;;  %v1963_v57 = vadd.f32 %v1962_v56, %v1950_v27  ;;  %v3363_v1 = vor.u32 %v4390_v52, %v3360_v53  ;;  %v3491_v2 = vor.u32 %v4422_v54, %v3488_v55  ;;  %v4314_v38 = vld [vmem:[#allocation5 + $0x2c] sm:$0xf]  ;;  %v3040_v52 = vld [vmem:[#allocation5 + $0x18] sm:$0xf0] }
 0x12d   :  { %v4378_v45 = vld [vmem:[#allocation5 + $0x22c] sm:$0xf]  ;;  %v3059_v50 = vor.u32 %v4314_v38, %v3056_v39  ;;  %v3168_v54 = vld [vmem:[#allocation5 + $0x118] sm:$0xf0] }
 0x12e   :  { %2169 = vmatmul.bf16.vlgmr.msra.gmra.mxu0 %v4869_v8  ;;  %2182 = vmatmul.bf16.vlgmr.msra.gmra.mxu1 %v4873_v13  ;;  %v1976_v11 = vadd.f32 %v1975_v61, %v1963_v57  ;;  %v4410_v47 = vld [vmem:[#allocation5 + $0x32c] sm:$0xf]  ;;  %v3315_v55 = vor.u32 %v4378_v45, %v3312_v46  ;;  %v3632_v38 = vld [vmem:[#allocation5 + $0x4b8] sm:$0xf0] }
 0x12f   :  { %2213 = vmatpush.bf16.msrb.mxu0 %v3155_v3  ;;  %2226 = vmatpush.bf16.msrb.mxu1 %v3283_v7  ;;  %v4354_v3 = vld [vmem:[#allocation5 + $0x16c] sm:$0xf]  ;;  %v3216_v7 = vld [vmem:[#allocation5 + $0x178] sm:$0xf0] }
 0x130   :  { %2239 = vmatpush.bf16.msrb.mxu2 %v3411_v16  ;;  %2252 = vmatpush.bf16.msrb.mxu3 %v3539_v17  ;;  %v3472_v16 = vld [vmem:[#allocation5 + $0x378] sm:$0xf0]  ;;  %v3091_v17 = vor.u32 %v4322_v62, %v3088_v63  ;;  %v3219_v18 = vor.u32 %v4354_v3, %v3216_v7  ;;  %v4342_v53 = vld [vmem:[#allocation5 + $0x10c] sm:$0xf] }
 0x131   :  { %2195 = vmatmul.bf16.vlgmr.msra.gmra.mxu2 %v4871_v9  ;;  %2208 = vmatmul.bf16.vlgmr.msra.gmra.mxu3 %v4875_v14  ;;  %v3475_v22 = vor.u32 %v4418_v15, %v3472_v16  ;;  %v4374_v57 = vld [vmem:[#allocation5 + $0x20c] sm:$0xf]  ;;  %v3424_v62 = vld [vmem:[#allocation5 + $0x318] sm:$0xf0]  ;;  %v3171_v12 = vor.u32 %v4342_v53, %v3168_v54 }
 0x132   :  { %v4466_v63 = vld [vmem:[#allocation5 + $0x4ec] sm:$0xf]  ;;  %v3792_v7 = vld [vmem:[#allocation5 + $0x5f8] sm:$0xf0] }
 0x133   :  { %2214 = vmatpush.bf16.msrb.mxu0 %v3139_v28  ;;  %2227 = vmatpush.bf16.msrb.mxu1 %v3267_v29  ;;  %v3328_v29 = vld [vmem:[#allocation5 + $0x258] sm:$0xf0]  ;;  %v1977_v40 = vpop.f32.mrf.mxu1  ;;  %v4498_v3 = vld [vmem:[#allocation5 + $0x5ec] sm:$0xf] }
 0x134   :  { %2240 = vmatpush.bf16.msrb.mxu2 %v3395_v32  ;;  %2253 = vmatpush.bf16.msrb.mxu3 %v3523_v33  ;;  %v1988_v23 = vpop.f32.mrf.mxu2  ;;  %v2001_v28 = vpop.f32.mrf.mxu3  ;;  %v3331_v41 = vor.u32 %v4382_v26, %v3328_v29  ;;  %v4530_v10 = vld [vmem:[#allocation5 + $0x6ec] sm:$0xf]  ;;  %v3920_v15 = vld [vmem:[#allocation5 + $0x6f8] sm:$0xf0] }
 0x135   :  { %v1989_v27 = vadd.f32 %v1988_v23, %v1976_v11  ;;  %v1964_v32 = vpop.f32.mrf.mxu0  ;;  %v4562_v16 = vld [vmem:[#allocation5 + $0x7ec] sm:$0xf]  ;;  %v3648_v23 = vld [vmem:[#allocation5 + $0x4d8] sm:$0xf0]  ;;  %v3923_v24 = vor.u32 %v4530_v10, %v3920_v15 }
 0x136   :  { %v4494_v26 = vld [vmem:[#allocation5 + $0x5cc] sm:$0xf]  ;;  %v3904_v29 = vld [vmem:[#allocation5 + $0x6d8] sm:$0xf0] }
 0x137   :  { %2215 = vmatpush.bf16.msrb.mxu0 %v3123_v42  ;;  %2228 = vmatpush.bf16.msrb.mxu1 %v3251_v43  ;;  %v4906_v33 = vadd.f32 %v2001_v28, %v1989_v27  ;;  %v3459_v42 = vor.u32 %v4414_v30, %v3456_v31  ;;  %v4346_v43 = vld [vmem:[#allocation5 + $0x12c] sm:$0xf]  ;;  %v3776_v27 = vld [vmem:[#allocation5 + $0x5d8] sm:$0xf0] }
 0x138   :  { %2241 = vmatpush.bf16.msrb.mxu2 %v3379_v48  ;;  %2254 = vmatpush.bf16.msrb.mxu3 %v3507_v49  ;;  %v3440_v48 = vld [vmem:[#allocation5 + $0x338] sm:$0xf0]  ;;  %v4310_v49 = vld [vmem:[#allocation5 + $0xc] sm:$0xf]  ;;  %v3187_v51 = vor.u32 %v4346_v43, %v3184_v44 }
 0x139   :  { %v3443_v56 = vor.u32 %v4410_v47, %v3440_v48  ;;  %v3043_v11 = vor.u32 %v4310_v49, %v3040_v52  ;;  %v4526_v28 = vld [vmem:[#allocation5 + $0x6cc] sm:$0xf]  ;;  %v4032_v31 = vld [vmem:[#allocation5 + $0x7d8] sm:$0xf0] }
 0x13a   :  { %v4558_v30 = vld [vmem:[#allocation5 + $0x7cc] sm:$0xf]  ;;  %v3907_v39 = vor.u32 %v4526_v28, %v3904_v29  ;;  %v3888_v44 = vld [vmem:[#allocation5 + $0x6b8] sm:$0xf0] }
 0x13b   :  { %2216 = vmatpush.bf16.msrb.mxu0 %v3107_v35  ;;  %2229 = vmatpush.bf16.msrb.mxu1 %v3235_v60  ;;  %v3296_v35 = vld [vmem:[#allocation5 + $0x218] sm:$0xf0]  ;;  %v4406_v60 = vld [vmem:[#allocation5 + $0x30c] sm:$0xf]  ;;  %v4035_v40 = vor.u32 %v4558_v30, %v4032_v31 }
 0x13c   :  { %2242 = vmatpush.bf16.msrb.mxu2 %v3363_v1  ;;  %2255 = vmatpush.bf16.msrb.mxu3 %v3491_v2  ;;  %v1990_v61 = vpop.f32.mrf.mxu2  ;;  %v3664_v1 = vld [vmem:[#allocation5 + $0x4f8] sm:$0xf0]  ;;  %v2003_v2 = vpop.f32.mrf.mxu3  ;;  %v3427_v19 = vor.u32 %v4406_v60, %v3424_v62  ;;  %v4522_v43 = vld [vmem:[#allocation5 + $0x6ac] sm:$0xf] }
 0x13d   :  { %v3667_v20 = vor.u32 %v4466_v63, %v3664_v1  ;;  %v4554_v45 = vld [vmem:[#allocation5 + $0x7ac] sm:$0xf]  ;;  %v4016_v46 = vld [vmem:[#allocation5 + $0x7b8] sm:$0xf0] }
 0x13e   :  { %v4454_v49 = vld [vmem:[#allocation5 + $0x48c] sm:$0xf]  ;;  %v4019_v52 = vor.u32 %v4554_v45, %v4016_v46  ;;  %v3744_v53 = vld [vmem:[#allocation5 + $0x598] sm:$0xf0] }
 0x13f   :  { %2217 = vmatpush.bf16.msrb.mxu0 %v3091_v17  ;;  %2230 = vmatpush.bf16.msrb.mxu1 %v3219_v18  ;;  %v4048_v17 = vld [vmem:[#allocation5 + $0x7f8] sm:$0xf0]  ;;  %v3299_v18 = vor.u32 %v4374_v57, %v3296_v35  ;;  %v4450_v60 = vld [vmem:[#allocation5 + $0x46c] sm:$0xf] }
 0x140   :  { %2243 = vmatpush.bf16.msrb.mxu2 %v3347_v21  ;;  %2256 = vmatpush.bf16.msrb.mxu3 %v3475_v22  ;;  %v3795_v21 = vor.u32 %v4498_v3, %v3792_v7  ;;  %v4462_v22 = vld [vmem:[#allocation5 + $0x4cc] sm:$0xf]  ;;  %v4051_v25 = vor.u32 %v4562_v16, %v4048_v17  ;;  %v3872_v54 = vld [vmem:[#allocation5 + $0x698] sm:$0xf0] }
 0x141   :  { %v3651_v32 = vor.u32 %v4462_v22, %v3648_v23  ;;  %v3600_v61 = vld [vmem:[#allocation5 + $0x478] sm:$0xf0]  ;;  %v4482_v1 = vld [vmem:[#allocation5 + $0x56c] sm:$0xf] }
 0x142   :  { %v3728_v2 = vld [vmem:[#allocation5 + $0x578] sm:$0xf0]  ;;  %v4514_v3 = vld [vmem:[#allocation5 + $0x66c] sm:$0xf] }
 0x143   :  { %2218 = vmatpush.bf16.msrb.mxu0 %v3075_v34  ;;  %2231 = vmatpush.bf16.msrb.mxu1 %v3203_v37  ;;  %v3779_v34 = vor.u32 %v4494_v26, %v3776_v27  ;;  %v4458_v37 = vld [vmem:[#allocation5 + $0x4ac] sm:$0xf]  ;;  %v3856_v7 = vld [vmem:[#allocation5 + $0x678] sm:$0xf0]  ;;  %v3731_v15 = vor.u32 %v4482_v1, %v3728_v2 }
 0x144   :  { %2244 = vmatpush.bf16.msrb.mxu2 %v3331_v41  ;;  %2257 = vmatpush.bf16.msrb.mxu3 %v3459_v42  ;;  %v4490_v41 = vld [vmem:[#allocation5 + $0x5ac] sm:$0xf]  ;;  %v3760_v42 = vld [vmem:[#allocation5 + $0x5b8] sm:$0xf0]  ;;  %v3635_v47 = vor.u32 %v4458_v37, %v3632_v38 }
 0x145   :  { %v3763_v48 = vor.u32 %v4490_v41, %v3760_v42  ;;  %v4546_v10 = vld [vmem:[#allocation5 + $0x76c] sm:$0xf]  ;;  %v3584_v17 = vld [vmem:[#allocation5 + $0x458] sm:$0xf0] }
 0x146   :  { %v4446_v16 = vld [vmem:[#allocation5 + $0x44c] sm:$0xf]  ;;  %v3712_v22 = vld [vmem:[#allocation5 + $0x558] sm:$0xf0] }
 0x147   :  { %2219 = vmatpush.bf16.msrb.mxu0 %v3059_v50  ;;  %2232 = vmatpush.bf16.msrb.mxu1 %v3187_v51  ;;  %v3616_v50 = vld [vmem:[#allocation5 + $0x498] sm:$0xf0]  ;;  %v3891_v51 = vor.u32 %v4522_v43, %v3888_v44  ;;  %v4510_v23 = vld [vmem:[#allocation5 + $0x64c] sm:$0xf]  ;;  %v3587_v29 = vor.u32 %v4446_v16, %v3584_v17  ;;  %v4626_v16 = vld [vmem:[#allocation8 + $0xe4] sm:$0xf0] }
 0x148   :  { %2245 = vmatpush.bf16.msrb.mxu2 %v3315_v55  ;;  %2258 = vmatpush.bf16.msrb.mxu3 %v3443_v56  ;;  %v4550_v55 = vld [vmem:[#allocation5 + $0x78c] sm:$0xf]  ;;  %v4000_v56 = vld [vmem:[#allocation5 + $0x798] sm:$0xf0] }
 0x149   :  { %v4003_v63 = vor.u32 %v4550_v55, %v4000_v56  ;;  %v4542_v26 = vld [vmem:[#allocation5 + $0x74c] sm:$0xf]  ;;  %v3968_v27 = vld [vmem:[#allocation5 + $0x758] sm:$0xf0]  ;;  %v4110_v56 = vld [vmem:[#allocation8 + $0x70] sm:$0xf] }
 0x14a   :  { %v4442_v31 = vld [vmem:[#allocation5 + $0x42c] sm:$0xf]  ;;  %v3971_v38 = vor.u32 %v4542_v26, %v3968_v27  ;;  %v3824_v42 = vld [vmem:[#allocation5 + $0x638] sm:$0xf0]  ;;  %v4086_v26 = vld [vmem:[#allocation8 + $0x40] sm:$0xf] }
 0x14b   :  { %2220 = vmatpush.bf16.msrb.mxu0 %v3043_v11  ;;  %2233 = vmatpush.bf16.msrb.mxu1 %v3171_v12  ;;  %v4912_v57 = vpop.f32.mrf.mxu0  ;;  %v4914_v35 = vpop.f32.mrf.mxu1  ;;  %v3984_v11 = vld [vmem:[#allocation5 + $0x778] sm:$0xf0]  ;;  %v3603_v12 = vor.u32 %v4450_v60, %v3600_v61  ;;  %v4506_v41 = vld [vmem:[#allocation5 + $0x62c] sm:$0xf]  ;;  %v4174_v60 = vld [vmem:[#allocation8 + $0xf0] sm:$0xf] }
 0x14c   :  { %2246 = vmatpush.bf16.msrb.mxu2 %v3299_v18  ;;  %2259 = vmatpush.bf16.msrb.mxu3 %v3427_v19  ;;  %v3859_v18 = vor.u32 %v4514_v3, %v3856_v7  ;;  %v3987_v19 = vor.u32 %v4546_v10, %v3984_v11  ;;  %v4538_v43 = vld [vmem:[#allocation5 + $0x72c] sm:$0xf]  ;;  %v3952_v44 = vld [vmem:[#allocation5 + $0x738] sm:$0xf0]  ;;  %v4628_v61 = vld [vmem:[#allocation8 + $0xf4] sm:$0xf0]  ;;  %v2015_v3 = vadd.f32 %v4912_v57, %v4895_v36 }
 0x14d   :  { %v3936_v55 = vld [vmem:[#allocation5 + $0x718] sm:$0xf0]  ;;  %v4175_v10 = vor.u32 %v4628_v61, %v4174_v60  ;;  %v4102_v11 = vld [vmem:[#allocation8 + $0x60] sm:$0xf]  ;;  %v4608_v36 = vld [vmem:[#allocation8 + $0x54] sm:$0xf0] }
 0x14e   :  { %2221 = vmatmul.bf16.vlgmr.msrb.gmra.mxu0 %v4857_v0  ;;  %2234 = vmatmul.bf16.vlgmr.msrb.gmra.mxu1 %v4859_v4  ;;  %v4486_v0 = vld [vmem:[#allocation5 + $0x58c] sm:$0xf]  ;;  %v3619_v4 = vor.u32 %v4454_v49, %v3616_v50  ;;  %v3827_v50 = vor.u32 %v4506_v41, %v3824_v42  ;;  %v2028_v17 = vadd.f32 %v4914_v35, %v2015_v3  ;;  %v4158_v57 = vld [vmem:[#allocation8 + $0xd0] sm:$0xf]  ;;  %v4606_v27 = vld [vmem:[#allocation8 + $0x44] sm:$0xf0] }
 0x14f   :  { %2265 = vmatpush.bf16.msra.mxu0 %v3667_v20  ;;  %2278 = vmatpush.bf16.msra.mxu1 %v3795_v21  ;;  %v4478_v21 = vld [vmem:[#allocation5 + $0x54c] sm:$0xf]  ;;  %v4062_v60 = vld [vmem:[#allocation8 + $0x10] sm:$0xf]  ;;  %v4616_v3 = vld [vmem:[#allocation8 + $0x94] sm:$0xf0] }
 0x150   :  { %2291 = vmatpush.bf16.msra.mxu2 %v3923_v24  ;;  %2304 = vmatpush.bf16.msra.mxu3 %v4051_v25  ;;  %v3840_v25 = vld [vmem:[#allocation5 + $0x658] sm:$0xf0]  ;;  %v3715_v30 = vor.u32 %v4478_v21, %v3712_v22  ;;  %v4470_v49 = vld [vmem:[#allocation5 + $0x50c] sm:$0xf]  ;;  %v4094_v21 = vld [vmem:[#allocation8 + $0x50] sm:$0xf] }
 0x151   :  { %2247 = vmatmul.bf16.vlgmr.msrb.gmra.mxu2 %v4861_v5  ;;  %2260 = vmatmul.bf16.vlgmr.msrb.gmra.mxu3 %v4863_v6  ;;  %v4518_v5 = vld [vmem:[#allocation5 + $0x68c] sm:$0xf]  ;;  %v3747_v6 = vor.u32 %v4486_v0, %v3744_v53  ;;  %v3843_v37 = vor.u32 %v4510_v23, %v3840_v25  ;;  %v3808_v53 = vld [vmem:[#allocation5 + $0x618] sm:$0xf0]  ;;  %v4624_v22 = vld [vmem:[#allocation8 + $0xd4] sm:$0xf0]  ;;  %v4095_v35 = vor.u32 %v4608_v36, %v4094_v21 }
 0x152   :  { %v3875_v62 = vor.u32 %v4518_v5, %v3872_v54  ;;  %v4502_v0 = vld [vmem:[#allocation5 + $0x60c] sm:$0xf]  ;;  %v4159_v25 = vor.u32 %v4624_v22, %v4158_v57  ;;  %v4611_v21 = vld [vmem:[#allocation8 + $0x74] sm:$0xf]  ;;  %v4112_v36 = vld [vmem:[#allocation8 + $0x78] sm:$0xf0] }
 0x153   :  { %2266 = vmatpush.bf16.msra.mxu0 %v3651_v32  ;;  %2279 = vmatpush.bf16.msra.mxu1 %v3779_v34  ;;  %v2016_v28 = vpop.f32.mrf.mxu0  ;;  %v3568_v32 = vld [vmem:[#allocation5 + $0x438] sm:$0xf0]  ;;  %v2029_v34 = vpop.f32.mrf.mxu1  ;;  %v4534_v54 = vld [vmem:[#allocation5 + $0x70c] sm:$0xf]  ;;  %v3811_v1 = vor.u32 %v4502_v0, %v3808_v53  ;;  %v4638_v22 = vld [vmem:[#allocation8 + $0x144] sm:$0xf0] }
 0x154   :  { %2292 = vmatpush.bf16.msra.mxu2 %v3907_v39  ;;  %2305 = vmatpush.bf16.msra.mxu3 %v4035_v40  ;;  %v4916_v20 = vpop.f32.mrf.mxu2  ;;  %v4918_v24 = vpop.f32.mrf.mxu3  ;;  %v4474_v39 = vld [vmem:[#allocation5 + $0x52c] sm:$0xf]  ;;  %v3696_v40 = vld [vmem:[#allocation5 + $0x538] sm:$0xf0]  ;;  %v3571_v45 = vor.u32 %v4442_v31, %v3568_v32  ;;  %v3939_v2 = vor.u32 %v4534_v54, %v3936_v55  ;;  %v4150_v28 = vld [vmem:[#allocation8 + $0xc0] sm:$0xf] }
 0x155   :  { %v3699_v46 = vor.u32 %v4474_v39, %v3696_v40  ;;  %v2041_v23 = vadd.f32 %v4916_v20, %v2028_v17  ;;  %v4078_v32 = vld [vmem:[#allocation8 + $0x30] sm:$0xf]  ;;  %v4620_v40 = vld [vmem:[#allocation8 + $0xb4] sm:$0xf0]  ;;  %v4118_v17 = vld [vmem:[#allocation8 + $0x80] sm:$0xf] }
 0x156   :  { %v4238_v34 = vld [vmem:[#allocation8 + $0x170] sm:$0xf] }
 0x157   :  { %2267 = vmatpush.bf16.msra.mxu0 %v3635_v47  ;;  %2280 = vmatpush.bf16.msra.mxu1 %v3763_v48  ;;  %v4438_v47 = vld [vmem:[#allocation5 + $0x40c] sm:$0xf]  ;;  %v3552_v48 = vld [vmem:[#allocation5 + $0x418] sm:$0xf0]  ;;  %v4142_v39 = vld [vmem:[#allocation8 + $0xb0] sm:$0xf] }
 0x158   :  { %2293 = vmatpush.bf16.msra.mxu2 %v3891_v51  ;;  %2306 = vmatpush.bf16.msra.mxu3 %v4019_v52  ;;  %v3955_v51 = vor.u32 %v4538_v43, %v3952_v44  ;;  %v3680_v52 = vld [vmem:[#allocation5 + $0x518] sm:$0xf0]  ;;  %v4143_v44 = vor.u32 %v4620_v40, %v4142_v39 }
 0x15b   :  { %2268 = vmatpush.bf16.msra.mxu0 %v3619_v4  ;;  %2281 = vmatpush.bf16.msra.mxu1 %v3747_v6  ;;  %v4612_v6 = vld [vmem:[#allocation8 + $0x74] sm:$0xf0] }
 0x15c   :  { %2294 = vmatpush.bf16.msra.mxu2 %v3875_v62  ;;  %2307 = vmatpush.bf16.msra.mxu3 %v4003_v63  ;;  %v2042_v5 = vpop.f32.mrf.mxu2  ;;  %v2055_v4 = vpop.f32.mrf.mxu3  ;;  %v3555_v62 = vor.u32 %v4438_v47, %v3552_v48  ;;  %v3683_v63 = vor.u32 %v4470_v49, %v3680_v52  ;;  %v4111_v7 = vor.u32 %v4612_v6, %v4110_v56  ;;  %v4642_v47 = vld [vmem:[#allocation8 + $0x164] sm:$0xf0] }
 0x15d   :  { %v4602_v49 = vld [vmem:[#allocation8 + $0x24] sm:$0xf0] }
 0x15f   :  { %2269 = vmatpush.bf16.msra.mxu0 %v3603_v12  ;;  %2282 = vmatpush.bf16.msra.mxu1 %v3731_v15  ;;  %v4610_v12 = vld [vmem:[#allocation8 + $0x64] sm:$0xf0]  ;;  %v4166_v15 = vld [vmem:[#allocation8 + $0xe0] sm:$0xf] }
 0x160   :  { %2295 = vmatpush.bf16.msra.mxu2 %v3859_v18  ;;  %2308 = vmatpush.bf16.msra.mxu3 %v3987_v19  ;;  %v4103_v18 = vor.u32 %v4610_v12, %v4102_v11  ;;  %v4167_v19 = vor.u32 %v4626_v16, %v4166_v15  ;;  %v4054_v11 = vld [vmem:[#allocation8] sm:$0xf]  ;;  %v4598_v12 = vld [vmem:[#allocation8 + $0x4] sm:$0xf0] }
 0x163   :  { %2270 = vmatpush.bf16.msra.mxu0 %v3587_v29  ;;  %2283 = vmatpush.bf16.msra.mxu1 %v3715_v30  ;;  %v4622_v29 = vld [vmem:[#allocation8 + $0xc4] sm:$0xf0] }
 0x164   :  { %2296 = vmatpush.bf16.msra.mxu2 %v3843_v37  ;;  %2309 = vmatpush.bf16.msra.mxu3 %v3971_v38  ;;  %v4151_v30 = vor.u32 %v4622_v29, %v4150_v28  ;;  %v4644_v37 = vld [vmem:[#allocation8 + $0x174] sm:$0xf0]  ;;  %v4055_v28 = vor.u32 %v4598_v12, %v4054_v11 }
 0x165   :  { %v4604_v38 = vld [vmem:[#allocation8 + $0x34] sm:$0xf0]  ;;  %v4239_v41 = vor.u32 %v4644_v37, %v4238_v34  ;;  %v4104_v34 = vld [vmem:[#allocation8 + $0x68] sm:$0xf0]  ;;  %v4625_v37 = vld [vmem:[#allocation8 + $0xe4] sm:$0xf] }
 0x166   :  { %v4079_v43 = vor.u32 %v4604_v38, %v4078_v32  ;;  %v4168_v38 = vld [vmem:[#allocation8 + $0xe8] sm:$0xf0] }
 0x167   :  { %2271 = vmatpush.bf16.msra.mxu0 %v3571_v45  ;;  %2284 = vmatpush.bf16.msra.mxu1 %v3699_v46  ;;  %v4070_v45 = vld [vmem:[#allocation8 + $0x20] sm:$0xf] }
 0x168   :  { %2297 = vmatpush.bf16.msra.mxu2 %v3827_v50  ;;  %2310 = vmatpush.bf16.msra.mxu3 %v3955_v51  ;;  %v4230_v46 = vld [vmem:[#allocation8 + $0x160] sm:$0xf]  ;;  %v4618_v51 = vld [vmem:[#allocation8 + $0xa4] sm:$0xf0]  ;;  %v4071_v4 = vor.u32 %v4602_v49, %v4070_v45  ;;  %v4607_v45 = vld [vmem:[#allocation8 + $0x54] sm:$0xf] }
 0x169   :  { %v4134_v50 = vld [vmem:[#allocation8 + $0xa0] sm:$0xf]  ;;  %v4231_v52 = vor.u32 %v4642_v47, %v4230_v46  ;;  %v4096_v46 = vld [vmem:[#allocation8 + $0x58] sm:$0xf0]  ;;  %v4623_v47 = vld [vmem:[#allocation8 + $0xd4] sm:$0xf] }
 0x16a   :  { %v4135_v6 = vor.u32 %v4618_v51, %v4134_v50  ;;  %v4190_v50 = vld [vmem:[#allocation8 + $0x110] sm:$0xf]  ;;  %v4632_v51 = vld [vmem:[#allocation8 + $0x114] sm:$0xf0] }
 0x16b   :  { %2272 = vmatpush.bf16.msra.mxu0 %v3555_v62  ;;  %2285 = vmatpush.bf16.msra.mxu1 %v3683_v63  ;;  %v2066_v20 = vpop.f32.mrf.mxu0  ;;  %v2079_v31 = vpop.f32.mrf.mxu1  ;;  %v4222_v62 = vld [vmem:[#allocation8 + $0x150] sm:$0xf]  ;;  %v4640_v63 = vld [vmem:[#allocation8 + $0x154] sm:$0xf0] }
 0x16c   :  { %2298 = vmatpush.bf16.msra.mxu2 %v3811_v1  ;;  %2311 = vmatpush.bf16.msra.mxu3 %v3939_v2  ;;  %v4600_v1 = vld [vmem:[#allocation8 + $0x14] sm:$0xf0]  ;;  %v4126_v2 = vld [vmem:[#allocation8 + $0x90] sm:$0xf] }
 0x16d   :  { %v4063_v15 = vor.u32 %v4600_v1, %v4062_v60  ;;  %v4127_v16 = vor.u32 %v4616_v3, %v4126_v2  ;;  %v4643_v1 = vld [vmem:[#allocation8 + $0x174] sm:$0xf]  ;;  %v4240_v2 = vld [vmem:[#allocation8 + $0x178] sm:$0xf0] }
 0x16e   :  { %2273 = vmatmul.bf16.vlgmr.msra.gmra.mxu0 %v4869_v8  ;;  %2286 = vmatmul.bf16.vlgmr.msra.gmra.mxu1 %v4873_v13  ;;  %v2054_v8 = vadd.f32 %v4918_v24, %v2041_v23  ;;  %v4932_v13 = vld [vmem:[%s4969_s4] sm:$0xf]  ;;  %v4243_v12 = vor.u32 %v4643_v1, %v4240_v2 }
 0x16f   :  { %2737 = vmatpush.bf16.msrb.mxu0 %v4111_v7  ;;  %2750 = vmatpush.bf16.msrb.mxu1 %v4175_v10  ;;  %v2319_v24 = vperm.slane %v4932_v13, 0  ;;  %v2320_v54 = vperm.slane %v4932_v13, 1  ;;  %v4223_v7 = vor.u32 %v4640_v63, %v4222_v62  ;;  %v4603_v63 = vld [vmem:[#allocation8 + $0x34] sm:$0xf] }
 0x170   :  { %2299 = vmatmul.bf16.vlgmr.msra.gmra.mxu2 %v4871_v9  ;;  %2312 = vmatmul.bf16.vlgmr.msra.gmra.mxu3 %v4875_v14  ;;  %v2067_v9 = vadd.f32 %v2066_v20, %v2054_v8  ;;  %v4087_v14 = vor.u32 %v4606_v27, %v4086_v26  ;;  %v4206_v8 = vld [vmem:[#allocation8 + $0x130] sm:$0xf]  ;;  %v4636_v20 = vld [vmem:[#allocation8 + $0x134] sm:$0xf0] }
 0x171   :  { %2763 = vmatpush.bf16.msrb.mxu2 %v4239_v41  ;;  %v2327_v0 = vadd.f32 %v2319_v24, %v4906_v33  ;;  %v4207_v39 = vor.u32 %v4636_v20, %v4206_v8  ;;  %v4198_v41 = vld [vmem:[#allocation8 + $0x120] sm:$0xf]  ;;  %v4634_v24 = vld [vmem:[#allocation8 + $0x124] sm:$0xf0]  ;;  %v4224_v8 = vld [vmem:[#allocation8 + $0x158] sm:$0xf0] }
 0x172   :  { %v2080_v42 = vadd.f32 %v2079_v31, %v2067_v9  ;;  %v4609_v31 = vld [vmem:[#allocation8 + $0x64] sm:$0xf]  ;;  %v4199_v49 = vor.u32 %v4634_v24, %v4198_v41  ;;  %v4064_v20 = vld [vmem:[#allocation8 + $0x18] sm:$0xf0]  ;;  %v4056_v41 = vld [vmem:[#allocation8 + $0x8] sm:$0xf0] }
 0x173   :  { %2738 = vmatpush.bf16.msrb.mxu0 %v4103_v18  ;;  %2751 = vmatpush.bf16.msrb.mxu1 %v4167_v19  ;;  %v2068_v55 = vpop.f32.mrf.mxu0  ;;  %v2081_v61 = vpop.f32.mrf.mxu1  ;;  %vm2331_vm2 = vcmp.gt.f32.partialorder %v2327_v0, 0.0  ;;  %v2335_v10 = vmul.f32 0.2, %v2327_v0  ;;  %v4614_v18 = vld [vmem:[#allocation8 + $0x84] sm:$0xf0] }
 0x174   :  { %v2092_v48 = vpop.f32.mrf.mxu2  ;;  %v2105_v5 = vpop.f32.mrf.mxu3  ;;  %v4214_v19 = vld [vmem:[#allocation8 + $0x140] sm:$0xf]  ;;  %v4119_v29 = vor.u32 %v4614_v18, %v4118_v17  ;;  %v4152_v55 = vld [vmem:[#allocation8 + $0xc8] sm:$0xf0]  ;;  %v4601_v17 = vld [vmem:[#allocation8 + $0x24] sm:$0xf] }
 0x175   :  { %v2093_v53 = vadd.f32 %v2092_v48, %v2080_v42  ;;  %2764 = vmatpush.bf16.msrb.mxu2 %v4231_v52  ;;  %v4215_v27 = vor.u32 %v4638_v22, %v4214_v19  ;;  %v2339_v9 = vsel %vm2331_vm2, %v2327_v0, %v2335_v10  ;;  %v4160_v48 = vld [vmem:[#allocation8 + $0xd8] sm:$0xf0]  ;;  %v4099_v52 = vor.u32 %v4607_v45, %v4096_v46  ;;  %v4641_v18 = vld [vmem:[#allocation8 + $0x164] sm:$0xf]  ;;  %v4232_v19 = vld [vmem:[#allocation8 + $0x168] sm:$0xf0] }
 0x176   :  { %v4938_v40 = vpack.c.bf16 %v2339_v9, %v2339_v9  ;;  %v4163_v0 = vor.u32 %v4623_v47, %v4160_v48  ;;  %v4144_v10 = vld [vmem:[#allocation8 + $0xb8] sm:$0xf0]  ;;  %v4615_v9 = vld [vmem:[#allocation8 + $0x94] sm:$0xf]  ;;  %v4613_v24 = vld [vmem:[#allocation8 + $0x84] sm:$0xf] }
 0x177   :  { %2739 = vmatpush.bf16.msrb.mxu0 %v4095_v35  ;;  %2752 = vmatpush.bf16.msrb.mxu1 %v4159_v25  ;;  %v2106_v56 = vadd.f32 %v2105_v5, %v2093_v53  ;;  %v4627_v35 = vld [vmem:[#allocation8 + $0xf4] sm:$0xf]  ;;  %v4176_v25 = vld [vmem:[#allocation8 + $0xf8] sm:$0xf0]  ;;  %v4605_v53 = vld [vmem:[#allocation8 + $0x44] sm:$0xf] }
 0x178   :  { %v4088_v5 = vld [vmem:[#allocation8 + $0x48] sm:$0xf0] }
 0x179   :  { %v2328_v33 = vadd.f32 %v2320_v54, %v2106_v56  ;;  %2765 = vmatpush.bf16.msrb.mxu2 %v4223_v7  ;;  %v4621_v54 = vld [vmem:[#allocation8 + $0xc4] sm:$0xf]  ;;  %v4191_v56 = vor.u32 %v4632_v51, %v4190_v50  ;;  %v4091_v61 = vor.u32 %v4605_v53, %v4088_v5  ;;  %v4080_v7 = vld [vmem:[#allocation8 + $0x38] sm:$0xf0]  ;;  %v4200_v53 = vld [vmem:[#allocation8 + $0x128] sm:$0xf0] }
 0x17a   :  { %v4155_v62 = vor.u32 %v4621_v54, %v4152_v55  ;;  %v4208_v50 = vld [vmem:[#allocation8 + $0x138] sm:$0xf0]  ;;  %v4631_v55 = vld [vmem:[#allocation8 + $0x114] sm:$0xf] }
 0x17b   :  { %2740 = vmatpush.bf16.msrb.mxu0 %v4087_v14  ;;  %2753 = vmatpush.bf16.msrb.mxu1 %v4151_v30  ;;  %v2336_v23 = vmul.f32 0.2, %v2328_v33  ;;  %vm2332_vm3 = vcmp.gt.f32.partialorder %v2328_v33, 0.0  ;;  %v4115_v14 = vor.u32 %v4611_v21, %v4112_v36  ;;  %v4179_v30 = vor.u32 %v4627_v35, %v4176_v25  ;;  %v4072_v21 = vld [vmem:[#allocation8 + $0x28] sm:$0xf0] }
 0x17c   :  { %v2094_v57 = vpop.f32.mrf.mxu2  ;;  %v2107_v26 = vpop.f32.mrf.mxu3  ;;  %v4617_v36 = vld [vmem:[#allocation8 + $0xa4] sm:$0xf]  ;;  %v4075_v25 = vor.u32 %v4601_v17, %v4072_v21  ;;  %v4278_v21 = vld [vmem:[#allocation8 + $0x1c0] sm:$0xf] }
 0x17d   :  { %2766 = vmatpush.bf16.msrb.mxu2 %v4215_v27  ;;  %v2340_v32 = vsel %vm2332_vm3, %v2328_v33, %v2336_v23  ;;  %v4619_v33 = vld [vmem:[#allocation8 + $0xb4] sm:$0xf]  ;;  %v4136_v57 = vld [vmem:[#allocation8 + $0xa8] sm:$0xf0]  ;;  %v4235_v23 = vor.u32 %v4641_v18, %v4232_v19  ;;  %v4286_v18 = vld [vmem:[#allocation8 + $0x1d0] sm:$0xf] }
 0x17e   :  { %v4940_v42 = vpack.c.bf16 %v2340_v32, %v2340_v32  ;;  %v4139_v26 = vor.u32 %v4617_v36, %v4136_v57  ;;  %v4599_v27 = vld [vmem:[#allocation8 + $0x14] sm:$0xf]  ;;  %v4656_v19 = vld [vmem:[#allocation8 + $0x1d4] sm:$0xf0] }
 0x17f   :  { %2741 = vmatpush.bf16.msrb.mxu0 %v4079_v43  ;;  %2754 = vmatpush.bf16.msrb.mxu1 %v4143_v44  ;;  %v4107_v43 = vor.u32 %v4609_v31, %v4104_v34  ;;  %v4171_v44 = vor.u32 %v4625_v37, %v4168_v38  ;;  %v4067_v32 = vor.u32 %v4599_v27, %v4064_v20  ;;  %v4597_v37 = vld [vmem:[#allocation8 + $0x4] sm:$0xf]  ;;  %v4270_v27 = vld [vmem:[#allocation8 + $0x1b0] sm:$0xf] }
 0x180   :  { %v4637_v38 = vld [vmem:[#allocation8 + $0x144] sm:$0xf]  ;;  %v4059_v47 = vor.u32 %v4597_v37, %v4056_v41  ;;  %v4287_v57 = vor.u32 %v4656_v19, %v4286_v18  ;;  %v4254_v37 = vld [vmem:[#allocation8 + $0x190] sm:$0xf]  ;;  %v4246_v41 = vld [vmem:[#allocation8 + $0x180] sm:$0xf] }
 0x181   :  { %2767 = vmatpush.bf16.msrb.mxu2 %v4207_v39  ;;  %v4216_v39 = vld [vmem:[#allocation8 + $0x148] sm:$0xf0] }
 0x182   :  { %v4219_v45 = vor.u32 %v4637_v38, %v4216_v39  ;;  %v4648_v38 = vld [vmem:[#allocation8 + $0x194] sm:$0xf0] }
 0x183   :  { %2742 = vmatpush.bf16.msrb.mxu0 %v4071_v4  ;;  %2755 = vmatpush.bf16.msrb.mxu1 %v4135_v6  ;;  %v4182_v4 = vld [vmem:[#allocation8 + $0x100] sm:$0xf]  ;;  %v4630_v6 = vld [vmem:[#allocation8 + $0x104] sm:$0xf0]  ;;  %v4255_v39 = vor.u32 %v4648_v38, %v4254_v37 }
 0x184   :  { %v4183_v11 = vor.u32 %v4630_v6, %v4182_v4 }
 0x185   :  { %2768 = vmatpush.bf16.msrb.mxu2 %v4199_v49  ;;  %v4635_v49 = vld [vmem:[#allocation8 + $0x134] sm:$0xf] }
 0x186   :  { %v4211_v51 = vor.u32 %v4635_v49, %v4208_v50  ;;  %v4657_v49 = vld [vmem:[#allocation8 + $0x1e4] sm:$0xf]  ;;  %v4296_v50 = vld [vmem:[#allocation8 + $0x1e8] sm:$0xf0] }
 0x187   :  { %2743 = vmatpush.bf16.msrb.mxu0 %v4063_v15  ;;  %2756 = vmatpush.bf16.msrb.mxu1 %v4127_v16  ;;  %v4083_v15 = vor.u32 %v4603_v63, %v4080_v7  ;;  %v4147_v16 = vor.u32 %v4619_v33, %v4144_v10  ;;  %v4660_v63 = vld [vmem:[#allocation8 + $0x1f4] sm:$0xf0]  ;;  %v4658_v10 = vld [vmem:[#allocation8 + $0x1e4] sm:$0xf0] }
 0x189   :  { %2769 = vmatpush.bf16.msrb.mxu2 %v4191_v56  ;;  %v4192_v56 = vld [vmem:[#allocation8 + $0x118] sm:$0xf0] }
 0x18a   :  { %v4195_v6 = vor.u32 %v4631_v55, %v4192_v56 }
 0x18b   :  { %2744 = vmatpush.bf16.msrb.mxu0 %v4055_v28  ;;  %2757 = vmatpush.bf16.msrb.mxu1 %v4119_v29  ;;  %v4944_v60 = vpop.f32.mrf.mxu0  ;;  %v4946_v3 = vpop.f32.mrf.mxu1  ;;  %v4639_v29 = vld [vmem:[#allocation8 + $0x154] sm:$0xf] }
 0x18c   :  { %v4227_v31 = vor.u32 %v4639_v29, %v4224_v8 }
 0x18d   :  { %2770 = vmatpush.bf16.msrb.mxu2 %v4183_v11 }
 0x18e   :  { %2745 = vmatmul.bf16.vlgmr.msrb.gmra.mxu0 %v4938_v40  ;;  %2758 = vmatmul.bf16.vlgmr.msrb.gmra.mxu1 %v4940_v42 }
 0x18f   :  { %2789 = vmatpush.bf16.msra.mxu0 %v4115_v14  ;;  %2802 = vmatpush.bf16.msra.mxu1 %v4179_v30  ;;  %v4128_v14 = vld [vmem:[#allocation8 + $0x98] sm:$0xf0] }
 0x190   :  { %v4131_v34 = vor.u32 %v4615_v9, %v4128_v14 }
 0x191   :  { %2815 = vmatpush.bf16.msra.mxu2 %v4243_v12 }
 0x193   :  { %2790 = vmatpush.bf16.msra.mxu0 %v4107_v43  ;;  %2803 = vmatpush.bf16.msra.mxu1 %v4171_v44  ;;  %v2120_v28 = vpop.f32.mrf.mxu0  ;;  %v2133_v30 = vpop.f32.mrf.mxu1  ;;  %v4120_v43 = vld [vmem:[#allocation8 + $0x88] sm:$0xf0] }
 0x194   :  { %v2144_v22 = vpop.f32.mrf.mxu2  ;;  %v2157_v35 = vpop.f32.mrf.mxu3  ;;  %v4123_v48 = vor.u32 %v4613_v24, %v4120_v43  ;;  %v4652_v28 = vld [vmem:[#allocation8 + $0x1b4] sm:$0xf0]  ;;  %v4262_v30 = vld [vmem:[#allocation8 + $0x1a0] sm:$0xf]  ;;  %v4646_v24 = vld [vmem:[#allocation8 + $0x184] sm:$0xf0] }
 0x195   :  { %2816 = vmatpush.bf16.msra.mxu2 %v4235_v23  ;;  %v4271_v20 = vor.u32 %v4652_v28, %v4270_v27  ;;  %v4247_v43 = vor.u32 %v4646_v24, %v4246_v41 }
 0x197   :  { %2791 = vmatpush.bf16.msra.mxu0 %v4099_v52  ;;  %2804 = vmatpush.bf16.msra.mxu1 %v4163_v0  ;;  %v2119_v52 = vadd.f32 %v4944_v60, %v4897_v58  ;;  %v4633_v0 = vld [vmem:[#allocation8 + $0x124] sm:$0xf]  ;;  %v4302_v60 = vld [vmem:[#allocation8 + $0x1f0] sm:$0xf] }
 0x198   :  { %v4203_v5 = vor.u32 %v4633_v0, %v4200_v53  ;;  %v4303_v7 = vor.u32 %v4660_v63, %v4302_v60  ;;  %v4655_v0 = vld [vmem:[#allocation8 + $0x1d4] sm:$0xf]  ;;  %v4288_v53 = vld [vmem:[#allocation8 + $0x1d8] sm:$0xf0] }
 0x199   :  { %2817 = vmatpush.bf16.msra.mxu2 %v4227_v31  ;;  %v2132_v54 = vadd.f32 %v4946_v3, %v2119_v52  ;;  %v4650_v31 = vld [vmem:[#allocation8 + $0x1a4] sm:$0xf0]  ;;  %v4272_v60 = vld [vmem:[#allocation8 + $0x1b8] sm:$0xf0] }
 0x19a   :  { %2776 = vmatpush.bf16.msrb.mxu3 %v4303_v7  ;;  %v4264_v7 = vld [vmem:[#allocation8 + $0x1a8] sm:$0xf0] }
 0x19b   :  { %2792 = vmatpush.bf16.msra.mxu0 %v4091_v61  ;;  %2805 = vmatpush.bf16.msra.mxu1 %v4155_v62  ;;  %v2145_v4 = vadd.f32 %v2144_v22, %v2132_v54  ;;  %v4629_v61 = vld [vmem:[#allocation8 + $0x104] sm:$0xf]  ;;  %v4184_v62 = vld [vmem:[#allocation8 + $0x108] sm:$0xf0]  ;;  %v4654_v22 = vld [vmem:[#allocation8 + $0x1c4] sm:$0xf0]  ;;  %v4291_v54 = vor.u32 %v4655_v0, %v4288_v53 }
 0x19c   :  { %v2146_v44 = vpop.f32.mrf.mxu2  ;;  %v2159_v46 = vpop.f32.mrf.mxu3  ;;  %v4187_v2 = vor.u32 %v4629_v61, %v4184_v62 }
 0x19d   :  { %2818 = vmatpush.bf16.msra.mxu2 %v4219_v45  ;;  %v2158_v58 = vadd.f32 %v2157_v35, %v2145_v4  ;;  %v4659_v44 = vld [vmem:[#allocation8 + $0x1f4] sm:$0xf]  ;;  %v4304_v45 = vld [vmem:[#allocation8 + $0x1f8] sm:$0xf0]  ;;  %v4653_v4 = vld [vmem:[#allocation8 + $0x1c4] sm:$0xf] }
 0x19e   :  { %v4307_v46 = vor.u32 %v4659_v44, %v4304_v45 }
 0x19f   :  { %2793 = vmatpush.bf16.msra.mxu0 %v4083_v15  ;;  %2806 = vmatpush.bf16.msra.mxu1 %v4147_v16  ;;  %v2321_v15 = vperm.slane %v4932_v13, 2 }
 0x1a1   :  { %2819 = vmatpush.bf16.msra.mxu2 %v4211_v51  ;;  %v4299_v51 = vor.u32 %v4657_v49, %v4296_v50 }
 0x1a3   :  { %2794 = vmatpush.bf16.msra.mxu0 %v4075_v25  ;;  %2807 = vmatpush.bf16.msra.mxu1 %v4139_v26  ;;  %v4279_v25 = vor.u32 %v4654_v22, %v4278_v21 }
 0x1a5   :  { %2820 = vmatpush.bf16.msra.mxu2 %v4203_v5 }
 0x1a7   :  { %2795 = vmatpush.bf16.msra.mxu0 %v4067_v32  ;;  %2808 = vmatpush.bf16.msra.mxu1 %v4131_v34  ;;  %v4263_v34 = vor.u32 %v4650_v31, %v4262_v30  ;;  %v2411_v30 = vld [vmem:[%s4971_s6] sm:$0x3] }
 0x1a8   :  { %v2413_v31 = vperm.slane %v2411_v30, 0  ;;  %v2414_v41 = vperm.slane %v2411_v30, 1 }
 0x1a9   :  { %2821 = vmatpush.bf16.msra.mxu2 %v4195_v6  ;;  %v4280_v6 = vld [vmem:[#allocation8 + $0x1c8] sm:$0xf0] }
 0x1aa   :  { %v4283_v61 = vor.u32 %v4653_v4, %v4280_v6 }
 0x1ab   :  { %2796 = vmatpush.bf16.msra.mxu0 %v4059_v47  ;;  %2809 = vmatpush.bf16.msra.mxu1 %v4123_v48  ;;  %v2170_v1 = vpop.f32.mrf.mxu0  ;;  %v2183_v3 = vpop.f32.mrf.mxu1 }
 0x1ac   :  { %v2171_v33 = vadd.f32 %v2170_v1, %v2158_v58  ;;  %v4651_v58 = vld [vmem:[#allocation8 + $0x1b4] sm:$0xf] }
 0x1ad   :  { %2822 = vmatpush.bf16.msra.mxu2 %v4187_v2  ;;  %v4275_v1 = vor.u32 %v4651_v58, %v4272_v60  ;;  %v4649_v2 = vld [vmem:[#allocation8 + $0x1a4] sm:$0xf] }
 0x1ae   :  { %2797 = vmatmul.bf16.vlgmr.msra.gmra.mxu0 %v4938_v40  ;;  %2810 = vmatmul.bf16.vlgmr.msra.gmra.mxu1 %v4940_v42  ;;  %v4294_v40 = vld [vmem:[#allocation8 + $0x1e0] sm:$0xf]  ;;  %v2184_v11 = vadd.f32 %v2183_v3, %v2171_v33  ;;  %v4267_v33 = vor.u32 %v4649_v2, %v4264_v7  ;;  %v4647_v3 = vld [vmem:[#allocation8 + $0x194] sm:$0xf] }
 0x1af   :  { %v4295_v42 = vor.u32 %v4658_v10, %v4294_v40  ;;  %v4256_v40 = vld [vmem:[#allocation8 + $0x198] sm:$0xf0] }
 0x1b1   :  { %2777 = vmatpush.bf16.msrb.mxu3 %v4295_v42  ;;  %v4259_v42 = vor.u32 %v4647_v3, %v4256_v40  ;;  %v4672_v3 = vld [vmem:[#allocation2] ss:$0 sm:$0xff] }
 0x1b3   :  { %v2172_v36 = vpop.f32.mrf.mxu0  ;;  %v2185_v35 = vpop.f32.mrf.mxu1 }
 0x1b4   :  { %v2196_v12 = vpop.f32.mrf.mxu2  ;;  %v2209_v17 = vpop.f32.mrf.mxu3 }
 0x1b5   :  { %v2197_v16 = vadd.f32 %v2196_v12, %v2184_v11  ;;  %2778 = vmatpush.bf16.msrb.mxu3 %v4287_v57 }
 0x1b7   :  { %v2210_v23 = vadd.f32 %v2209_v17, %v2197_v16  ;;  %v4248_v16 = vld [vmem:[#allocation8 + $0x188] sm:$0xf0] }
 0x1b9   :  { %v2329_v26 = vadd.f32 %v2321_v15, %v2210_v23  ;;  %2779 = vmatpush.bf16.msrb.mxu3 %v4279_v25  ;;  %v4645_v15 = vld [vmem:[#allocation8 + $0x184] sm:$0xf]  ;;  %v2322_v25 = vperm.slane %v4932_v13, 3 }
 0x1ba   :  { %v4251_v17 = vor.u32 %v4645_v15, %v4248_v16 }
 0x1bb   :  { %vm2333_vm4 = vcmp.gt.f32.partialorder %v2329_v26, 0.0  ;;  %v2337_v29 = vmul.f32 0.2, %v2329_v26 }
 0x1bc   :  { %v2198_v8 = vpop.f32.mrf.mxu2  ;;  %v2211_v14 = vpop.f32.mrf.mxu3 }
 0x1bd   :  { %v2341_v9 = vsel %vm2333_vm4, %v2329_v26, %v2337_v29  ;;  %2780 = vmatpush.bf16.msrb.mxu3 %v4271_v20 }
 0x1be   :  { %v2345_v32 = vpack.c.bf16 %v2341_v9, %v2341_v9 }
 0x1c0   :  { %2771 = vmatmul.bf16.vlgmr.msrb.gmra.mxu2 %v2345_v32 }
 0x1c1   :  { %2781 = vmatpush.bf16.msrb.mxu3 %v4263_v34 }
 0x1c5   :  { %2782 = vmatpush.bf16.msrb.mxu3 %v4255_v39 }
 0x1c9   :  { %2783 = vmatpush.bf16.msrb.mxu3 %v4247_v43 }
 0x1cb   :  { %v2222_v47 = vpop.f32.mrf.mxu0  ;;  %v2235_v48 = vpop.f32.mrf.mxu1 }
 0x1cc   :  { %v2223_v10 = vadd.f32 %v2222_v47, %v4899_v59 }
 0x1cd   :  { %2828 = vmatpush.bf16.msra.mxu3 %v4307_v46 }
 0x1ce   :  { %v2236_v11 = vadd.f32 %v2235_v48, %v2223_v10 }
 0x1d0   :  { %2823 = vmatmul.bf16.vlgmr.msra.gmra.mxu2 %v2345_v32 }
 0x1d1   :  { %2829 = vmatpush.bf16.msra.mxu3 %v4299_v51 }
 0x1d3   :  { %v2224_v55 = vpop.f32.mrf.mxu0  ;;  %v2237_v56 = vpop.f32.mrf.mxu1 }
 0x1d4   :  { %v2248_v52 = vpop.f32.mrf.mxu2  ;;  %v2261_v5 = vpop.f32.mrf.mxu3  ;;  %v2847_v56 = vld [vmem:[%s4972_s7] sm:$0x3] }
 0x1d5   :  { %2830 = vmatpush.bf16.msra.mxu3 %v4291_v54  ;;  %v2249_v12 = vadd.f32 %v2248_v52, %v2236_v11 }
 0x1d7   :  { %v2262_v18 = vadd.f32 %v2261_v5, %v2249_v12 }
 0x1d9   :  { %2831 = vmatpush.bf16.msra.mxu3 %v4283_v61  ;;  %v2849_v61 = vperm.slane %v2847_v56, 0 }
 0x1dc   :  { %v2250_v62 = vpop.f32.mrf.mxu2  ;;  %v2263_v63 = vpop.f32.mrf.mxu3 }
 0x1dd   :  { %2832 = vmatpush.bf16.msra.mxu3 %v4275_v1  ;;  %v2850_v62 = vperm.slane %v2847_v56, 1 }
 0x1e1   :  { %2833 = vmatpush.bf16.msra.mxu3 %v4267_v33 }
 0x1e5   :  { %2834 = vmatpush.bf16.msra.mxu3 %v4259_v42 }
 0x1e9   :  { %2835 = vmatpush.bf16.msra.mxu3 %v4251_v17 }
 0x1eb   :  { %v2274_v19 = vpop.f32.mrf.mxu0  ;;  %v2287_v21 = vpop.f32.mrf.mxu1 }
 0x1ec   :  { %v2275_v36 = vadd.f32 %v2274_v19, %v2262_v18 }
 0x1ee   :  { %v2288_v57 = vadd.f32 %v2287_v21, %v2275_v36 }
 0x1f3   :  { %v2300_v22 = vpop.f32.mrf.mxu2  ;;  %v2313_v23 = vpop.f32.mrf.mxu3 }
 0x1f4   :  { %v2301_v35 = vadd.f32 %v2300_v22, %v2288_v57  ;;  %v2276_v59 = vpop.f32.mrf.mxu0  ;;  %v2289_v26 = vpop.f32.mrf.mxu1 }
 0x1f6   :  { %v2314_v27 = vadd.f32 %v2313_v23, %v2301_v35 }
 0x1f8   :  { %v2330_v28 = vadd.f32 %v2322_v25, %v2314_v27 }
 0x1fa   :  { %vm2334_vm5 = vcmp.gt.f32.partialorder %v2330_v28, 0.0  ;;  %v2338_v29 = vmul.f32 0.2, %v2330_v28 }
 0x1fb   :  { %v2302_v8 = vpop.f32.mrf.mxu2  ;;  %v2315_v20 = vpop.f32.mrf.mxu3 }
 0x1fc   :  { %v2342_v9 = vsel %vm2334_vm5, %v2330_v28, %v2338_v29 }
 0x1fd   :  { %v2346_v14 = vpack.c.bf16 %v2342_v9, %v2342_v9 }
 0x1ff   :  { %2784 = vmatmul.bf16.vlgmr.msrb.gmra.mxu3 %v2346_v14 }
 0x20b   :  { %v2746_v32 = vpop.f32.mrf.mxu0  ;;  %v2759_v34 = vpop.f32.mrf.mxu1 }
 0x20c   :  { %v2747_v37 = vadd.f32 %v2746_v32, %v2413_v31 }
 0x20e   :  { %v2760_v13 = vadd.f32 %v2759_v34, %v2747_v37 }
 0x20f   :  { %2836 = vmatmul.bf16.vlgmr.msra.gmra.mxu3 %v2346_v14 }
 0x213   :  { %v2748_v38 = vpop.f32.mrf.mxu0  ;;  %v2761_v39 = vpop.f32.mrf.mxu1 }
 0x22b   :  { %v2798_v24 = vpop.f32.mrf.mxu0  ;;  %v2811_v43 = vpop.f32.mrf.mxu1 }
 0x22c   :  { %v2799_v44 = vadd.f32 %v2798_v24, %v2414_v41 }
 0x22e   :  { %v2812_v45 = vadd.f32 %v2811_v43, %v2799_v44 }
 0x233   :  { %v2800_v46 = vpop.f32.mrf.mxu0  ;;  %v2813_v47 = vpop.f32.mrf.mxu1 }
 0x243   :  { %v2772_v48 = vpop.f32.mrf.mxu2 }
 0x244   :  { %v2773_v49 = vadd.f32 %v2772_v48, %v2760_v13 }
 0x24b   :  { %v2774_v50 = vpop.f32.mrf.mxu2 }
 0x253   :  { %v2824_v51 = vpop.f32.mrf.mxu2 }
 0x254   :  { %v2825_v54 = vadd.f32 %v2824_v51, %v2812_v45 }
 0x25b   :  { %v2826_v52 = vpop.f32.mrf.mxu2 }
 0x282   :  { %v2785_v0 = vpop.f32.mrf.mxu3 }
 0x283   :  { %v2786_v5 = vadd.f32 %v2785_v0, %v2773_v49 }
 0x285   :  { %v2843_v55 = vmul.f32 0.2, %v2786_v5  ;;  %vm2841_vm6 = vcmp.gt.f32.partialorder %v2786_v5, 0.0 }
 0x287   :  { %v2845_v60 = vsel %vm2841_vm6, %v2786_v5, %v2843_v55 }
 0x288   :  { %v2853_v1 = vmul.f32 %v2849_v61, %v2845_v60 }
 0x28a   :  { %v2787_v53 = vpop.f32.mrf.mxu3 }
 0x292   :  { %v2837_v4 = vpop.f32.mrf.mxu3 }
 0x293   :  { %v2838_v6 = vadd.f32 %v2837_v4, %v2825_v54 }
 0x295   :  { %vm2842_vm7 = vcmp.gt.f32.partialorder %v2838_v6, 0.0  ;;  %v2844_v58 = vmul.f32 0.2, %v2838_v6 }
 0x297   :  { %v2846_v63 = vsel %vm2842_vm7, %v2838_v6, %v2844_v58 }
 0x298   :  { %v2854_v2 = vmul.f32 %v2850_v62, %v2846_v63 }
 0x29a   :  { %v2839_v7 = vpop.f32.mrf.mxu3  ;;  %v2855_v33 = vadd.f32 %v2854_v2, %v2853_v1 }
 0x29c   :  { %2856 = vadd.xlane.f32.xlu0 %v2855_v33 }
 0x30f   :  { %v2857_v40 = vpop.xlane.xlu0 %2856 }
 0x310   :  { %v2862_v10 = vadd.f32 %v4672_v3, %v2857_v40 }
 0x312   :  { %v4308_v42 = vmul.f32 -1.442695, %v2862_v10 }
 0x314   :  { %4673 = vpow2.f32 %v4308_v42 }
 0x31a   :  { %v4674_v11 = vpop.eup %4673 }
 0x31b   :  { %v2866_v12 = vadd.f32 1.0, %v4674_v11 }
 0x31d   :  { %4675 = vrcp.f32 %v2866_v12  ;;  %v2878_v18 = vand.u32 2147483648, %v2866_v12  ;;  %v2876_v21 = vand.u32 2147483647, %v2866_v12  ;;  %vm2872_vm9 = vweird.f32 %v2866_v12 }
 0x31f   :  { %v2879_v57 = vor.u32 1.1754944e-38, %v2878_v18  ;;  %vm2877_vm12 = vcmp.eq.f32.partialorder %v2876_v21, 8.507059e+37 }
 0x323   :  { %v4676_v15 = vpop.eup %4675 }
 0x324   :  { %v2868_v16 = vmul.f32 %v4676_v15, %v2866_v12  ;;  %vm2873_vm8 = vweird.f32 %v4676_v15 }
 0x325   :  { %vm2874_vm11 = vmor %vm2872_vm9, %vm2873_vm8 }
 0x326   :  { %v2869_v17 = vsub.f32 1.0, %v2868_v16 }
 0x328   :  { %v2870_v19 = vmul.f32 %v4676_v15, %v2869_v17 }
 0x32a   :  { %v2871_v36 = vadd.f32 %v4676_v15, %v2870_v19 }
 0x32c   :  { %v2875_v22 = vsel %vm2874_vm11, %v4676_v15, %v2871_v36 }
 0x32d   :  { %v2880_v23 = vsel %vm2877_vm12, %v2879_v57, %v2875_v22 }
 0x32e   :  { %2883 = vst.msk [vmem:[%s4974_s9] sm:$0xff] %vm2882_vm10, %v2880_v23 }
 0x32f   :  { %2888 = vsyncpa [#allocation4], 1 }
 0x330   :  { %2889 = vsyncpa [#allocation6], 1 }
 0x331   :  { %2890 = vsyncpa [#allocation9], 1 }

</bundles_post_ra>
